<compile_context>
chip_gen: v7x
topology: tpu7x:2x2x1
jax: 0.10.0
libtpu: 0.0.40
codegen_flags: <defaults>
</compile_context>

<pallas_src>
import jax
import jax.numpy as jnp
from jax.experimental import pallas as pl
from jax.experimental.pallas import tpu as pltpu

HIDDEN_DIM = 1
WEATHER_DIM = 4
NUM_GATES = 4

# Flat SMEM parameter-blob offsets (H = HIDDEN_DIM = 1, row-major flatten).
_OFF_WIH1 = 0            # (1, 4)
_OFF_WHH1 = 4            # (1, 4)
_OFF_WWH1 = 8            # (4, 4)
_OFF_B1 = 24             # (1, 4)
_OFF_WIH2 = 28           # (1, 4)
_OFF_WHH2 = 32           # (1, 4)
_OFF_WWH2 = 36           # (4, 4)
_OFF_B2 = 52             # (1, 4)
_OFF_FCW = 56            # (1, 1)
_OFF_FCB = 57            # (1, 1)
_N_PARAMS = 58


def _sigmoid(z):
    # EUP-friendly sigmoid: transcendental stays in the EUP slot, no VALU divide.
    return 0.5 * (jnp.tanh(0.5 * z) + 1.0)


def _pew_lstm_kernel(xser_ref, wx_ref, p_ref, out_ref,
                     pre1_ref, h1_ref, pre2_ref):
    T, B = xser_ref.shape

    x = xser_ref[...]                                  # (T, B) series values
    wth = [wx_ref[k] for k in range(WEATHER_DIM)]      # 4 x (T, B), loaded once

    def scal(i):                                       # SMEM scalar read
        return p_ref[i]

    def precompute(pre_ref, x_seq, off_wih, off_wwh, off_b):
        # One vectorized (T, B) slab per gate: x*W_ih + sum_k weather_k*W_wh + b.
        for g in range(NUM_GATES):
            acc = x_seq * scal(off_wih + g) + scal(off_b + g)
            for k in range(WEATHER_DIM):
                acc = acc + wth[k] * scal(off_wwh + k * NUM_GATES + g)
            pre_ref[pl.ds(g * T, T), :] = acc

    def recurrence(pre_ref, off_whh, emit):
        whh = [scal(off_whh + g) for g in range(NUM_GATES)]   # hoisted scalars
        h = jnp.zeros((1, B), jnp.float32)
        c = jnp.zeros((1, B), jnp.float32)
        # T is a small static trip count -> fully unrolled recurrence.
        for t in range(T):
            i_t = _sigmoid(pre_ref[pl.ds(0 * T + t, 1), :] + h * whh[0])
            f_t = _sigmoid(pre_ref[pl.ds(1 * T + t, 1), :] + h * whh[1])
            g_t = jnp.tanh(pre_ref[pl.ds(2 * T + t, 1), :] + h * whh[2])
            o_t = _sigmoid(pre_ref[pl.ds(3 * T + t, 1), :] + h * whh[3])
            c = f_t * c + i_t * g_t
            h = o_t * jnp.tanh(c)
            emit(t, h)

    # ---- layer 1 ----
    precompute(pre1_ref, x, _OFF_WIH1, _OFF_WWH1, _OFF_B1)

    def store_h1(t, h):
        h1_ref[pl.ds(t, 1), :] = h

    recurrence(pre1_ref, _OFF_WHH1, store_h1)

    # ---- layer 2 (FC head fused into the per-step output store) ----
    precompute(pre2_ref, h1_ref[...], _OFF_WIH2, _OFF_WWH2, _OFF_B2)
    fcw = scal(_OFF_FCW)
    fcb = scal(_OFF_FCB)

    def store_out(t, h):
        out_ref[pl.ds(t, 1), :] = h * fcw + fcb

    recurrence(pre2_ref, _OFF_WHH2, store_out)


def pack_params(params):
    flat = jnp.concatenate(
        [jnp.asarray(p, jnp.float32).reshape(-1) for p in params])
    assert flat.shape[0] == _N_PARAMS
    return flat


def pew_lstm_forward(inp, params):
    """inp: (B, T, 4 weather + 1 target) f32 -> (B*T,) f32 (matches torch .view(-1))."""
    B, T, F = inp.shape
    inp = inp.astype(jnp.float32)
    # Wrapper-side layout plumbing only: pre-split, lane-major presentation.
    x_series = jnp.transpose(inp[:, :, F - 1], (1, 0))        # (T, B)
    x_weather = jnp.transpose(inp[:, :, :F - 1], (2, 1, 0))   # (4, T, B)
    flat_params = pack_params(params)                         # (58,) -> SMEM

    out_tb = pl.pallas_call(
        _pew_lstm_kernel,
        out_shape=jax.ShapeDtypeStruct((T, B), jnp.float32),
        in_specs=[
            pl.BlockSpec(memory_space=pltpu.MemorySpace.VMEM),   # series (T,B)
            pl.BlockSpec(memory_space=pltpu.MemorySpace.VMEM),   # weather (4,T,B)
            pl.BlockSpec(memory_space=pltpu.MemorySpace.SMEM),   # packed params
        ],
        out_specs=pl.BlockSpec(memory_space=pltpu.MemorySpace.VMEM),
        scratch_shapes=[
            pltpu.VMEM((NUM_GATES * T, B), jnp.float32),   # layer-1 pre-acts
            pltpu.VMEM((T, B), jnp.float32),               # layer-1 hidden seq
            pltpu.VMEM((NUM_GATES * T, B), jnp.float32),   # layer-2 pre-acts
        ],
    )(x_series, x_weather, flat_params)
    # (T, B) -> batch-major flatten, matching torch h2.view(-1, H) ordering.
    return jnp.transpose(out_tb, (1, 0)).reshape(-1)


def init_params(key):
    H = HIDDEN_DIM

    def xavier(k, shape):
        fan_in, fan_out = shape
        bound = (6.0 / (fan_in + fan_out)) ** 0.5
        return jax.random.uniform(k, shape, jnp.float32, -bound, bound)

    ks = jax.random.split(key, 11)
    wih1 = xavier(ks[0], (1, 4 * H))
    whh1 = xavier(ks[1], (H, 4 * H))
    wwh1 = xavier(ks[2], (WEATHER_DIM, 4 * H))
    b1 = jnp.zeros((1, 4 * H), jnp.float32)
    wih2 = xavier(ks[3], (H, 4 * H))
    whh2 = xavier(ks[4], (H, 4 * H))
    wwh2 = xavier(ks[5], (WEATHER_DIM, 4 * H))
    b2 = jnp.zeros((1, 4 * H), jnp.float32)
    fcw = xavier(ks[6], (1, H))           # nn.Linear(H, 1).weight, xavier_uniform_
    fcb = jnp.zeros((1, 1), jnp.float32)  # deterministic zero bias
    return (wih1, whh1, wwh1, b1, wih2, whh2, wwh2, b2, fcw, fcb)


def reference_forward(inp, params):
    """Plain-JAX reference implementing the identical math (torch semantics)."""
    (wih1, whh1, wwh1, b1, wih2, whh2, wwh2, b2, fcw, fcb) = params
    B, T, F = inp.shape
    H = HIDDEN_DIM
    x_weather = inp[:, :, :F - 1]
    x_input = inp[:, :, F - 1:F]

    def layer(x_seq, wih, whh, wwh, b):
        h = jnp.zeros((B, H), jnp.float32)
        c = jnp.zeros((B, H), jnp.float32)
        hs = []
        for t in range(T):
            gates = (x_seq[:, t, :] @ wih + h @ whh
                     + x_weather[:, t, :] @ wwh + b[0][None, :])
            i_t = jax.nn.sigmoid(gates[:, :H])
            f_t = jax.nn.sigmoid(gates[:, H:2 * H])
            g_t = jnp.tanh(gates[:, 2 * H:3 * H])
            o_t = jax.nn.sigmoid(gates[:, 3 * H:])
            c = f_t * c + i_t * g_t
            h = o_t * jnp.tanh(c)
            hs.append(h)
        return jnp.stack(hs, axis=1)

    h1 = layer(x_input, wih1, whh1, wwh1, b1)
    h2 = layer(h1, wih2, whh2, wwh2, b2)
    out = (h2.reshape(-1, H) @ fcw.T + fcb[0]).reshape(-1)
    return out


if __name__ == "__main__":
    key = jax.random.PRNGKey(0)
    k_in, k_par = jax.random.split(key)

    B, T, F = 2, 8, WEATHER_DIM + 1        # (batch, seq, 4 weather + 1 target)
    inp = jax.random.normal(k_in, (B, T, F), jnp.float32)
    params = init_params(k_par)

    out = jax.block_until_ready(pew_lstm_forward(inp, params))
    ref = reference_forward(inp, params)

    assert out.shape == (B * T,)
    assert jnp.allclose(out, ref, rtol=1e-4, atol=1e-5), (out, ref)

    print("KERNEL_OK")
</pallas_src>

<mosaic_0001>
module attributes {stable_mosaic.version = 11 : i64} {
  func.func @_pew_lstm_kernel(%arg0: memref<8x2xf32, #tpu.memory_space<vmem>>, %arg1: memref<4x8x2xf32, #tpu.memory_space<vmem>>, %arg2: memref<58xf32, #tpu.memory_space<smem>>, %arg3: memref<8x2xf32, #tpu.memory_space<vmem>>, %arg4: memref<32x2xf32, #tpu.memory_space<vmem>>, %arg5: memref<8x2xf32, #tpu.memory_space<vmem>>, %arg6: memref<32x2xf32, #tpu.memory_space<vmem>>) attributes {dimension_semantics = [], scalar_prefetch = 0 : i64, scratch_operands = 3 : i64, tpu.core_type = #tpu.core_type<tc>} {
    %c0 = arith.constant 0 : index
    %c0_0 = arith.constant 0 : index
    %0 = vector.load %arg0[%c0, %c0_0] : memref<8x2xf32, #tpu.memory_space<vmem>>, vector<8x2xf32>
    %c0_1 = arith.constant 0 : index
    %c0_2 = arith.constant 0 : index
    %c0_3 = arith.constant 0 : index
    %1 = vector.load %arg1[%c0_1, %c0_2, %c0_3] : memref<4x8x2xf32, #tpu.memory_space<vmem>>, vector<1x8x2xf32>
    %2 = vector.shape_cast %1 : vector<1x8x2xf32> to vector<8x2xf32>
    %c1 = arith.constant 1 : index
    %c0_4 = arith.constant 0 : index
    %c0_5 = arith.constant 0 : index
    %3 = vector.load %arg1[%c1, %c0_4, %c0_5] : memref<4x8x2xf32, #tpu.memory_space<vmem>>, vector<1x8x2xf32>
    %4 = vector.shape_cast %3 : vector<1x8x2xf32> to vector<8x2xf32>
    %c2 = arith.constant 2 : index
    %c0_6 = arith.constant 0 : index
    %c0_7 = arith.constant 0 : index
    %5 = vector.load %arg1[%c2, %c0_6, %c0_7] : memref<4x8x2xf32, #tpu.memory_space<vmem>>, vector<1x8x2xf32>
    %6 = vector.shape_cast %5 : vector<1x8x2xf32> to vector<8x2xf32>
    %c3 = arith.constant 3 : index
    %c0_8 = arith.constant 0 : index
    %c0_9 = arith.constant 0 : index
    %7 = vector.load %arg1[%c3, %c0_8, %c0_9] : memref<4x8x2xf32, #tpu.memory_space<vmem>>, vector<1x8x2xf32>
    %8 = vector.shape_cast %7 : vector<1x8x2xf32> to vector<8x2xf32>
    %c0_10 = arith.constant 0 : index
    %9 = memref.load %arg2[%c0_10] : memref<58xf32, #tpu.memory_space<smem>>
    %10 = vector.broadcast %9 : f32 to vector<8x2xf32>
    %11 = arith.mulf %0, %10 : vector<8x2xf32>
    %c24 = arith.constant 24 : index
    %12 = memref.load %arg2[%c24] : memref<58xf32, #tpu.memory_space<smem>>
    %13 = vector.broadcast %12 : f32 to vector<8x2xf32>
    %14 = arith.addf %11, %13 : vector<8x2xf32>
    %c8 = arith.constant 8 : index
    %15 = memref.load %arg2[%c8] : memref<58xf32, #tpu.memory_space<smem>>
    %16 = vector.broadcast %15 : f32 to vector<8x2xf32>
    %17 = arith.mulf %2, %16 : vector<8x2xf32>
    %18 = arith.addf %14, %17 : vector<8x2xf32>
    %c12 = arith.constant 12 : index
    %19 = memref.load %arg2[%c12] : memref<58xf32, #tpu.memory_space<smem>>
    %20 = vector.broadcast %19 : f32 to vector<8x2xf32>
    %21 = arith.mulf %4, %20 : vector<8x2xf32>
    %22 = arith.addf %18, %21 : vector<8x2xf32>
    %c16 = arith.constant 16 : index
    %23 = memref.load %arg2[%c16] : memref<58xf32, #tpu.memory_space<smem>>
    %24 = vector.broadcast %23 : f32 to vector<8x2xf32>
    %25 = arith.mulf %6, %24 : vector<8x2xf32>
    %26 = arith.addf %22, %25 : vector<8x2xf32>
    %c20 = arith.constant 20 : index
    %27 = memref.load %arg2[%c20] : memref<58xf32, #tpu.memory_space<smem>>
    %28 = vector.broadcast %27 : f32 to vector<8x2xf32>
    %29 = arith.mulf %8, %28 : vector<8x2xf32>
    %30 = arith.addf %26, %29 : vector<8x2xf32>
    %c0_11 = arith.constant 0 : index
    %c0_12 = arith.constant 0 : index
    %31 = vector.load %arg4[%c0_11, %c0_12] : memref<32x2xf32, #tpu.memory_space<vmem>>, vector<8x2xf32>
    tpu.vector_store %arg4[%c0_11, %c0_12], %30 {strides = array<i32>} : memref<32x2xf32, #tpu.memory_space<vmem>>, vector<8x2xf32>,
    %c1_13 = arith.constant 1 : index
    %32 = memref.load %arg2[%c1_13] : memref<58xf32, #tpu.memory_space<smem>>
    %33 = vector.broadcast %32 : f32 to vector<8x2xf32>
    %34 = arith.mulf %0, %33 : vector<8x2xf32>
    %c25 = arith.constant 25 : index
    %35 = memref.load %arg2[%c25] : memref<58xf32, #tpu.memory_space<smem>>
    %36 = vector.broadcast %35 : f32 to vector<8x2xf32>
    %37 = arith.addf %34, %36 : vector<8x2xf32>
    %c9 = arith.constant 9 : index
    %38 = memref.load %arg2[%c9] : memref<58xf32, #tpu.memory_space<smem>>
    %39 = vector.broadcast %38 : f32 to vector<8x2xf32>
    %40 = arith.mulf %2, %39 : vector<8x2xf32>
    %41 = arith.addf %37, %40 : vector<8x2xf32>
    %c13 = arith.constant 13 : index
    %42 = memref.load %arg2[%c13] : memref<58xf32, #tpu.memory_space<smem>>
    %43 = vector.broadcast %42 : f32 to vector<8x2xf32>
    %44 = arith.mulf %4, %43 : vector<8x2xf32>
    %45 = arith.addf %41, %44 : vector<8x2xf32>
    %c17 = arith.constant 17 : index
    %46 = memref.load %arg2[%c17] : memref<58xf32, #tpu.memory_space<smem>>
    %47 = vector.broadcast %46 : f32 to vector<8x2xf32>
    %48 = arith.mulf %6, %47 : vector<8x2xf32>
    %49 = arith.addf %45, %48 : vector<8x2xf32>
    %c21 = arith.constant 21 : index
    %50 = memref.load %arg2[%c21] : memref<58xf32, #tpu.memory_space<smem>>
    %51 = vector.broadcast %50 : f32 to vector<8x2xf32>
    %52 = arith.mulf %8, %51 : vector<8x2xf32>
    %53 = arith.addf %49, %52 : vector<8x2xf32>
    %c8_14 = arith.constant 8 : index
    %c0_15 = arith.constant 0 : index
    %54 = vector.load %arg4[%c8_14, %c0_15] : memref<32x2xf32, #tpu.memory_space<vmem>>, vector<8x2xf32>
    tpu.vector_store %arg4[%c8_14, %c0_15], %53 {strides = array<i32>} : memref<32x2xf32, #tpu.memory_space<vmem>>, vector<8x2xf32>,
    %c2_16 = arith.constant 2 : index
    %55 = memref.load %arg2[%c2_16] : memref<58xf32, #tpu.memory_space<smem>>
    %56 = vector.broadcast %55 : f32 to vector<8x2xf32>
    %57 = arith.mulf %0, %56 : vector<8x2xf32>
    %c26 = arith.constant 26 : index
    %58 = memref.load %arg2[%c26] : memref<58xf32, #tpu.memory_space<smem>>
    %59 = vector.broadcast %58 : f32 to vector<8x2xf32>
    %60 = arith.addf %57, %59 : vector<8x2xf32>
    %c10 = arith.constant 10 : index
    %61 = memref.load %arg2[%c10] : memref<58xf32, #tpu.memory_space<smem>>
    %62 = vector.broadcast %61 : f32 to vector<8x2xf32>
    %63 = arith.mulf %2, %62 : vector<8x2xf32>
    %64 = arith.addf %60, %63 : vector<8x2xf32>
    %c14 = arith.constant 14 : index
    %65 = memref.load %arg2[%c14] : memref<58xf32, #tpu.memory_space<smem>>
    %66 = vector.broadcast %65 : f32 to vector<8x2xf32>
    %67 = arith.mulf %4, %66 : vector<8x2xf32>
    %68 = arith.addf %64, %67 : vector<8x2xf32>
    %c18 = arith.constant 18 : index
    %69 = memref.load %arg2[%c18] : memref<58xf32, #tpu.memory_space<smem>>
    %70 = vector.broadcast %69 : f32 to vector<8x2xf32>
    %71 = arith.mulf %6, %70 : vector<8x2xf32>
    %72 = arith.addf %68, %71 : vector<8x2xf32>
    %c22 = arith.constant 22 : index
    %73 = memref.load %arg2[%c22] : memref<58xf32, #tpu.memory_space<smem>>
    %74 = vector.broadcast %73 : f32 to vector<8x2xf32>
    %75 = arith.mulf %8, %74 : vector<8x2xf32>
    %76 = arith.addf %72, %75 : vector<8x2xf32>
    %c16_17 = arith.constant 16 : index
    %c0_18 = arith.constant 0 : index
    %77 = vector.load %arg4[%c16_17, %c0_18] : memref<32x2xf32, #tpu.memory_space<vmem>>, vector<8x2xf32>
    tpu.vector_store %arg4[%c16_17, %c0_18], %76 {strides = array<i32>} : memref<32x2xf32, #tpu.memory_space<vmem>>, vector<8x2xf32>,
    %c3_19 = arith.constant 3 : index
    %78 = memref.load %arg2[%c3_19] : memref<58xf32, #tpu.memory_space<smem>>
    %79 = vector.broadcast %78 : f32 to vector<8x2xf32>
    %80 = arith.mulf %0, %79 : vector<8x2xf32>
    %c27 = arith.constant 27 : index
    %81 = memref.load %arg2[%c27] : memref<58xf32, #tpu.memory_space<smem>>
    %82 = vector.broadcast %81 : f32 to vector<8x2xf32>
    %83 = arith.addf %80, %82 : vector<8x2xf32>
    %c11 = arith.constant 11 : index
    %84 = memref.load %arg2[%c11] : memref<58xf32, #tpu.memory_space<smem>>
    %85 = vector.broadcast %84 : f32 to vector<8x2xf32>
    %86 = arith.mulf %2, %85 : vector<8x2xf32>
    %87 = arith.addf %83, %86 : vector<8x2xf32>
    %c15 = arith.constant 15 : index
    %88 = memref.load %arg2[%c15] : memref<58xf32, #tpu.memory_space<smem>>
    %89 = vector.broadcast %88 : f32 to vector<8x2xf32>
    %90 = arith.mulf %4, %89 : vector<8x2xf32>
    %91 = arith.addf %87, %90 : vector<8x2xf32>
    %c19 = arith.constant 19 : index
    %92 = memref.load %arg2[%c19] : memref<58xf32, #tpu.memory_space<smem>>
    %93 = vector.broadcast %92 : f32 to vector<8x2xf32>
    %94 = arith.mulf %6, %93 : vector<8x2xf32>
    %95 = arith.addf %91, %94 : vector<8x2xf32>
    %c23 = arith.constant 23 : index
    %96 = memref.load %arg2[%c23] : memref<58xf32, #tpu.memory_space<smem>>
    %97 = vector.broadcast %96 : f32 to vector<8x2xf32>
    %98 = arith.mulf %8, %97 : vector<8x2xf32>
    %99 = arith.addf %95, %98 : vector<8x2xf32>
    %c24_20 = arith.constant 24 : index
    %c0_21 = arith.constant 0 : index
    %100 = vector.load %arg4[%c24_20, %c0_21] : memref<32x2xf32, #tpu.memory_space<vmem>>, vector<8x2xf32>
    tpu.vector_store %arg4[%c24_20, %c0_21], %99 {strides = array<i32>} : memref<32x2xf32, #tpu.memory_space<vmem>>, vector<8x2xf32>,
    %c4 = arith.constant 4 : index
    %101 = memref.load %arg2[%c4] : memref<58xf32, #tpu.memory_space<smem>>
    %c5 = arith.constant 5 : index
    %102 = memref.load %arg2[%c5] : memref<58xf32, #tpu.memory_space<smem>>
    %c6 = arith.constant 6 : index
    %103 = memref.load %arg2[%c6] : memref<58xf32, #tpu.memory_space<smem>>
    %c7 = arith.constant 7 : index
    %104 = memref.load %arg2[%c7] : memref<58xf32, #tpu.memory_space<smem>>
    %cst = arith.constant 0.000000e+00 : f32
    %105 = vector.broadcast %cst : f32 to vector<1x2xf32>
    %cst_22 = arith.constant 0.000000e+00 : f32
    %106 = vector.broadcast %cst_22 : f32 to vector<1x2xf32>
    %c0_23 = arith.constant 0 : index
    %c0_24 = arith.constant 0 : index
    %107 = vector.load %arg4[%c0_23, %c0_24] : memref<32x2xf32, #tpu.memory_space<vmem>>, vector<1x2xf32>
    %108 = vector.broadcast %101 : f32 to vector<1x2xf32>
    %109 = arith.mulf %105, %108 : vector<1x2xf32>
    %110 = arith.addf %107, %109 : vector<1x2xf32>
    %cst_25 = arith.constant 5.000000e-01 : f32
    %111 = vector.broadcast %cst_25 : f32 to vector<1x2xf32>
    %112 = arith.mulf %111, %110 : vector<1x2xf32>
    %113 = math.tanh %112 : vector<1x2xf32>
    %cst_26 = arith.constant 1.000000e+00 : f32
    %114 = vector.broadcast %cst_26 : f32 to vector<1x2xf32>
    %115 = arith.addf %113, %114 : vector<1x2xf32>
    %cst_27 = arith.constant 5.000000e-01 : f32
    %116 = vector.broadcast %cst_27 : f32 to vector<1x2xf32>
    %117 = arith.mulf %116, %115 : vector<1x2xf32>
    %c8_28 = arith.constant 8 : index
    %c0_29 = arith.constant 0 : index
    %118 = vector.load %arg4[%c8_28, %c0_29] : memref<32x2xf32, #tpu.memory_space<vmem>>, vector<1x2xf32>
    %119 = vector.broadcast %102 : f32 to vector<1x2xf32>
    %120 = arith.mulf %105, %119 : vector<1x2xf32>
    %121 = arith.addf %118, %120 : vector<1x2xf32>
    %cst_30 = arith.constant 5.000000e-01 : f32
    %122 = vector.broadcast %cst_30 : f32 to vector<1x2xf32>
    %123 = arith.mulf %122, %121 : vector<1x2xf32>
    %124 = math.tanh %123 : vector<1x2xf32>
    %cst_31 = arith.constant 1.000000e+00 : f32
    %125 = vector.broadcast %cst_31 : f32 to vector<1x2xf32>
    %126 = arith.addf %124, %125 : vector<1x2xf32>
    %cst_32 = arith.constant 5.000000e-01 : f32
    %127 = vector.broadcast %cst_32 : f32 to vector<1x2xf32>
    %128 = arith.mulf %127, %126 : vector<1x2xf32>
    %c16_33 = arith.constant 16 : index
    %c0_34 = arith.constant 0 : index
    %129 = vector.load %arg4[%c16_33, %c0_34] : memref<32x2xf32, #tpu.memory_space<vmem>>, vector<1x2xf32>
    %130 = vector.broadcast %103 : f32 to vector<1x2xf32>
    %131 = arith.mulf %105, %130 : vector<1x2xf32>
    %132 = arith.addf %129, %131 : vector<1x2xf32>
    %133 = math.tanh %132 : vector<1x2xf32>
    %c24_35 = arith.constant 24 : index
    %c0_36 = arith.constant 0 : index
    %134 = vector.load %arg4[%c24_35, %c0_36] : memref<32x2xf32, #tpu.memory_space<vmem>>, vector<1x2xf32>
    %135 = vector.broadcast %104 : f32 to vector<1x2xf32>
    %136 = arith.mulf %105, %135 : vector<1x2xf32>
    %137 = arith.addf %134, %136 : vector<1x2xf32>
    %cst_37 = arith.constant 5.000000e-01 : f32
    %138 = vector.broadcast %cst_37 : f32 to vector<1x2xf32>
    %139 = arith.mulf %138, %137 : vector<1x2xf32>
    %140 = math.tanh %139 : vector<1x2xf32>
    %cst_38 = arith.constant 1.000000e+00 : f32
    %141 = vector.broadcast %cst_38 : f32 to vector<1x2xf32>
    %142 = arith.addf %140, %141 : vector<1x2xf32>
    %cst_39 = arith.constant 5.000000e-01 : f32
    %143 = vector.broadcast %cst_39 : f32 to vector<1x2xf32>
    %144 = arith.mulf %143, %142 : vector<1x2xf32>
    %145 = arith.mulf %128, %106 : vector<1x2xf32>
    %146 = arith.mulf %117, %133 : vector<1x2xf32>
    %147 = arith.addf %145, %146 : vector<1x2xf32>
    %148 = math.tanh %147 : vector<1x2xf32>
    %149 = arith.mulf %144, %148 : vector<1x2xf32>
    %c0_40 = arith.constant 0 : index
    %c0_41 = arith.constant 0 : index
    %150 = vector.load %arg5[%c0_40, %c0_41] : memref<8x2xf32, #tpu.memory_space<vmem>>, vector<1x2xf32>
    tpu.vector_store %arg5[%c0_40, %c0_41], %149 {strides = array<i32>} : memref<8x2xf32, #tpu.memory_space<vmem>>, vector<1x2xf32>,
    %c1_42 = arith.constant 1 : index
    %c0_43 = arith.constant 0 : index
    %151 = vector.load %arg4[%c1_42, %c0_43] : memref<32x2xf32, #tpu.memory_space<vmem>>, vector<1x2xf32>
    %152 = vector.broadcast %101 : f32 to vector<1x2xf32>
    %153 = arith.mulf %149, %152 : vector<1x2xf32>
    %154 = arith.addf %151, %153 : vector<1x2xf32>
    %cst_44 = arith.constant 5.000000e-01 : f32
    %155 = vector.broadcast %cst_44 : f32 to vector<1x2xf32>
    %156 = arith.mulf %155, %154 : vector<1x2xf32>
    %157 = math.tanh %156 : vector<1x2xf32>
    %cst_45 = arith.constant 1.000000e+00 : f32
    %158 = vector.broadcast %cst_45 : f32 to vector<1x2xf32>
    %159 = arith.addf %157, %158 : vector<1x2xf32>
    %cst_46 = arith.constant 5.000000e-01 : f32
    %160 = vector.broadcast %cst_46 : f32 to vector<1x2xf32>
    %161 = arith.mulf %160, %159 : vector<1x2xf32>
    %c9_47 = arith.constant 9 : index
    %c0_48 = arith.constant 0 : index
    %162 = vector.load %arg4[%c9_47, %c0_48] : memref<32x2xf32, #tpu.memory_space<vmem>>, vector<1x2xf32>
    %163 = vector.broadcast %102 : f32 to vector<1x2xf32>
    %164 = arith.mulf %149, %163 : vector<1x2xf32>
    %165 = arith.addf %162, %164 : vector<1x2xf32>
    %cst_49 = arith.constant 5.000000e-01 : f32
    %166 = vector.broadcast %cst_49 : f32 to vector<1x2xf32>
    %167 = arith.mulf %166, %165 : vector<1x2xf32>
    %168 = math.tanh %167 : vector<1x2xf32>
    %cst_50 = arith.constant 1.000000e+00 : f32
    %169 = vector.broadcast %cst_50 : f32 to vector<1x2xf32>
    %170 = arith.addf %168, %169 : vector<1x2xf32>
    %cst_51 = arith.constant 5.000000e-01 : f32
    %171 = vector.broadcast %cst_51 : f32 to vector<1x2xf32>
    %172 = arith.mulf %171, %170 : vector<1x2xf32>
    %c17_52 = arith.constant 17 : index
    %c0_53 = arith.constant 0 : index
    %173 = vector.load %arg4[%c17_52, %c0_53] : memref<32x2xf32, #tpu.memory_space<vmem>>, vector<1x2xf32>
    %174 = vector.broadcast %103 : f32 to vector<1x2xf32>
    %175 = arith.mulf %149, %174 : vector<1x2xf32>
    %176 = arith.addf %173, %175 : vector<1x2xf32>
    %177 = math.tanh %176 : vector<1x2xf32>
    %c25_54 = arith.constant 25 : index
    %c0_55 = arith.constant 0 : index
    %178 = vector.load %arg4[%c25_54, %c0_55] : memref<32x2xf32, #tpu.memory_space<vmem>>, vector<1x2xf32>
    %179 = vector.broadcast %104 : f32 to vector<1x2xf32>
    %180 = arith.mulf %149, %179 : vector<1x2xf32>
    %181 = arith.addf %178, %180 : vector<1x2xf32>
    %cst_56 = arith.constant 5.000000e-01 : f32
    %182 = vector.broadcast %cst_56 : f32 to vector<1x2xf32>
    %183 = arith.mulf %182, %181 : vector<1x2xf32>
    %184 = math.tanh %183 : vector<1x2xf32>
    %cst_57 = arith.constant 1.000000e+00 : f32
    %185 = vector.broadcast %cst_57 : f32 to vector<1x2xf32>
    %186 = arith.addf %184, %185 : vector<1x2xf32>
    %cst_58 = arith.constant 5.000000e-01 : f32
    %187 = vector.broadcast %cst_58 : f32 to vector<1x2xf32>
    %188 = arith.mulf %187, %186 : vector<1x2xf32>
    %189 = arith.mulf %172, %147 : vector<1x2xf32>
    %190 = arith.mulf %161, %177 : vector<1x2xf32>
    %191 = arith.addf %189, %190 : vector<1x2xf32>
    %192 = math.tanh %191 : vector<1x2xf32>
    %193 = arith.mulf %188, %192 : vector<1x2xf32>
    %c1_59 = arith.constant 1 : index
    %c0_60 = arith.constant 0 : index
    %194 = vector.load %arg5[%c1_59, %c0_60] : memref<8x2xf32, #tpu.memory_space<vmem>>, vector<1x2xf32>
    tpu.vector_store %arg5[%c1_59, %c0_60], %193 {strides = array<i32>} : memref<8x2xf32, #tpu.memory_space<vmem>>, vector<1x2xf32>,
    %c2_61 = arith.constant 2 : index
    %c0_62 = arith.constant 0 : index
    %195 = vector.load %arg4[%c2_61, %c0_62] : memref<32x2xf32, #tpu.memory_space<vmem>>, vector<1x2xf32>
    %196 = vector.broadcast %101 : f32 to vector<1x2xf32>
    %197 = arith.mulf %193, %196 : vector<1x2xf32>
    %198 = arith.addf %195, %197 : vector<1x2xf32>
    %cst_63 = arith.constant 5.000000e-01 : f32
    %199 = vector.broadcast %cst_63 : f32 to vector<1x2xf32>
    %200 = arith.mulf %199, %198 : vector<1x2xf32>
    %201 = math.tanh %200 : vector<1x2xf32>
    %cst_64 = arith.constant 1.000000e+00 : f32
    %202 = vector.broadcast %cst_64 : f32 to vector<1x2xf32>
    %203 = arith.addf %201, %202 : vector<1x2xf32>
    %cst_65 = arith.constant 5.000000e-01 : f32
    %204 = vector.broadcast %cst_65 : f32 to vector<1x2xf32>
    %205 = arith.mulf %204, %203 : vector<1x2xf32>
    %c10_66 = arith.constant 10 : index
    %c0_67 = arith.constant 0 : index
    %206 = vector.load %arg4[%c10_66, %c0_67] : memref<32x2xf32, #tpu.memory_space<vmem>>, vector<1x2xf32>
    %207 = vector.broadcast %102 : f32 to vector<1x2xf32>
    %208 = arith.mulf %193, %207 : vector<1x2xf32>
    %209 = arith.addf %206, %208 : vector<1x2xf32>
    %cst_68 = arith.constant 5.000000e-01 : f32
    %210 = vector.broadcast %cst_68 : f32 to vector<1x2xf32>
    %211 = arith.mulf %210, %209 : vector<1x2xf32>
    %212 = math.tanh %211 : vector<1x2xf32>
    %cst_69 = arith.constant 1.000000e+00 : f32
    %213 = vector.broadcast %cst_69 : f32 to vector<1x2xf32>
    %214 = arith.addf %212, %213 : vector<1x2xf32>
    %cst_70 = arith.constant 5.000000e-01 : f32
    %215 = vector.broadcast %cst_70 : f32 to vector<1x2xf32>
    %216 = arith.mulf %215, %214 : vector<1x2xf32>
    %c18_71 = arith.constant 18 : index
    %c0_72 = arith.constant 0 : index
    %217 = vector.load %arg4[%c18_71, %c0_72] : memref<32x2xf32, #tpu.memory_space<vmem>>, vector<1x2xf32>
    %218 = vector.broadcast %103 : f32 to vector<1x2xf32>
    %219 = arith.mulf %193, %218 : vector<1x2xf32>
    %220 = arith.addf %217, %219 : vector<1x2xf32>
    %221 = math.tanh %220 : vector<1x2xf32>
    %c26_73 = arith.constant 26 : index
    %c0_74 = arith.constant 0 : index
    %222 = vector.load %arg4[%c26_73, %c0_74] : memref<32x2xf32, #tpu.memory_space<vmem>>, vector<1x2xf32>
    %223 = vector.broadcast %104 : f32 to vector<1x2xf32>
    %224 = arith.mulf %193, %223 : vector<1x2xf32>
    %225 = arith.addf %222, %224 : vector<1x2xf32>
    %cst_75 = arith.constant 5.000000e-01 : f32
    %226 = vector.broadcast %cst_75 : f32 to vector<1x2xf32>
    %227 = arith.mulf %226, %225 : vector<1x2xf32>
    %228 = math.tanh %227 : vector<1x2xf32>
    %cst_76 = arith.constant 1.000000e+00 : f32
    %229 = vector.broadcast %cst_76 : f32 to vector<1x2xf32>
    %230 = arith.addf %228, %229 : vector<1x2xf32>
    %cst_77 = arith.constant 5.000000e-01 : f32
    %231 = vector.broadcast %cst_77 : f32 to vector<1x2xf32>
    %232 = arith.mulf %231, %230 : vector<1x2xf32>
    %233 = arith.mulf %216, %191 : vector<1x2xf32>
    %234 = arith.mulf %205, %221 : vector<1x2xf32>
    %235 = arith.addf %233, %234 : vector<1x2xf32>
    %236 = math.tanh %235 : vector<1x2xf32>
    %237 = arith.mulf %232, %236 : vector<1x2xf32>
    %c2_78 = arith.constant 2 : index
    %c0_79 = arith.constant 0 : index
    %238 = vector.load %arg5[%c2_78, %c0_79] : memref<8x2xf32, #tpu.memory_space<vmem>>, vector<1x2xf32>
    tpu.vector_store %arg5[%c2_78, %c0_79], %237 {strides = array<i32>} : memref<8x2xf32, #tpu.memory_space<vmem>>, vector<1x2xf32>,
    %c3_80 = arith.constant 3 : index
    %c0_81 = arith.constant 0 : index
    %239 = vector.load %arg4[%c3_80, %c0_81] : memref<32x2xf32, #tpu.memory_space<vmem>>, vector<1x2xf32>
    %240 = vector.broadcast %101 : f32 to vector<1x2xf32>
    %241 = arith.mulf %237, %240 : vector<1x2xf32>
    %242 = arith.addf %239, %241 : vector<1x2xf32>
    %cst_82 = arith.constant 5.000000e-01 : f32
    %243 = vector.broadcast %cst_82 : f32 to vector<1x2xf32>
    %244 = arith.mulf %243, %242 : vector<1x2xf32>
    %245 = math.tanh %244 : vector<1x2xf32>
    %cst_83 = arith.constant 1.000000e+00 : f32
    %246 = vector.broadcast %cst_83 : f32 to vector<1x2xf32>
    %247 = arith.addf %245, %246 : vector<1x2xf32>
    %cst_84 = arith.constant 5.000000e-01 : f32
    %248 = vector.broadcast %cst_84 : f32 to vector<1x2xf32>
    %249 = arith.mulf %248, %247 : vector<1x2xf32>
    %c11_85 = arith.constant 11 : index
    %c0_86 = arith.constant 0 : index
    %250 = vector.load %arg4[%c11_85, %c0_86] : memref<32x2xf32, #tpu.memory_space<vmem>>, vector<1x2xf32>
    %251 = vector.broadcast %102 : f32 to vector<1x2xf32>
    %252 = arith.mulf %237, %251 : vector<1x2xf32>
    %253 = arith.addf %250, %252 : vector<1x2xf32>
    %cst_87 = arith.constant 5.000000e-01 : f32
    %254 = vector.broadcast %cst_87 : f32 to vector<1x2xf32>
    %255 = arith.mulf %254, %253 : vector<1x2xf32>
    %256 = math.tanh %255 : vector<1x2xf32>
    %cst_88 = arith.constant 1.000000e+00 : f32
    %257 = vector.broadcast %cst_88 : f32 to vector<1x2xf32>
    %258 = arith.addf %256, %257 : vector<1x2xf32>
    %cst_89 = arith.constant 5.000000e-01 : f32
    %259 = vector.broadcast %cst_89 : f32 to vector<1x2xf32>
    %260 = arith.mulf %259, %258 : vector<1x2xf32>
    %c19_90 = arith.constant 19 : index
    %c0_91 = arith.constant 0 : index
    %261 = vector.load %arg4[%c19_90, %c0_91] : memref<32x2xf32, #tpu.memory_space<vmem>>, vector<1x2xf32>
    %262 = vector.broadcast %103 : f32 to vector<1x2xf32>
    %263 = arith.mulf %237, %262 : vector<1x2xf32>
    %264 = arith.addf %261, %263 : vector<1x2xf32>
    %265 = math.tanh %264 : vector<1x2xf32>
    %c27_92 = arith.constant 27 : index
    %c0_93 = arith.constant 0 : index
    %266 = vector.load %arg4[%c27_92, %c0_93] : memref<32x2xf32, #tpu.memory_space<vmem>>, vector<1x2xf32>
    %267 = vector.broadcast %104 : f32 to vector<1x2xf32>
    %268 = arith.mulf %237, %267 : vector<1x2xf32>
    %269 = arith.addf %266, %268 : vector<1x2xf32>
    %cst_94 = arith.constant 5.000000e-01 : f32
    %270 = vector.broadcast %cst_94 : f32 to vector<1x2xf32>
    %271 = arith.mulf %270, %269 : vector<1x2xf32>
    %272 = math.tanh %271 : vector<1x2xf32>
    %cst_95 = arith.constant 1.000000e+00 : f32
    %273 = vector.broadcast %cst_95 : f32 to vector<1x2xf32>
    %274 = arith.addf %272, %273 : vector<1x2xf32>
    %cst_96 = arith.constant 5.000000e-01 : f32
    %275 = vector.broadcast %cst_96 : f32 to vector<1x2xf32>
    %276 = arith.mulf %275, %274 : vector<1x2xf32>
    %277 = arith.mulf %260, %235 : vector<1x2xf32>
    %278 = arith.mulf %249, %265 : vector<1x2xf32>
    %279 = arith.addf %277, %278 : vector<1x2xf32>
    %280 = math.tanh %279 : vector<1x2xf32>
    %281 = arith.mulf %276, %280 : vector<1x2xf32>
    %c3_97 = arith.constant 3 : index
    %c0_98 = arith.constant 0 : index
    %282 = vector.load %arg5[%c3_97, %c0_98] : memref<8x2xf32, #tpu.memory_space<vmem>>, vector<1x2xf32>
    tpu.vector_store %arg5[%c3_97, %c0_98], %281 {strides = array<i32>} : memref<8x2xf32, #tpu.memory_space<vmem>>, vector<1x2xf32>,
    %c4_99 = arith.constant 4 : index
    %c0_100 = arith.constant 0 : index
    %283 = vector.load %arg4[%c4_99, %c0_100] : memref<32x2xf32, #tpu.memory_space<vmem>>, vector<1x2xf32>
    %284 = vector.broadcast %101 : f32 to vector<1x2xf32>
    %285 = arith.mulf %281, %284 : vector<1x2xf32>
    %286 = arith.addf %283, %285 : vector<1x2xf32>
    %cst_101 = arith.constant 5.000000e-01 : f32
    %287 = vector.broadcast %cst_101 : f32 to vector<1x2xf32>
    %288 = arith.mulf %287, %286 : vector<1x2xf32>
    %289 = math.tanh %288 : vector<1x2xf32>
    %cst_102 = arith.constant 1.000000e+00 : f32
    %290 = vector.broadcast %cst_102 : f32 to vector<1x2xf32>
    %291 = arith.addf %289, %290 : vector<1x2xf32>
    %cst_103 = arith.constant 5.000000e-01 : f32
    %292 = vector.broadcast %cst_103 : f32 to vector<1x2xf32>
    %293 = arith.mulf %292, %291 : vector<1x2xf32>
    %c12_104 = arith.constant 12 : index
    %c0_105 = arith.constant 0 : index
    %294 = vector.load %arg4[%c12_104, %c0_105] : memref<32x2xf32, #tpu.memory_space<vmem>>, vector<1x2xf32>
    %295 = vector.broadcast %102 : f32 to vector<1x2xf32>
    %296 = arith.mulf %281, %295 : vector<1x2xf32>
    %297 = arith.addf %294, %296 : vector<1x2xf32>
    %cst_106 = arith.constant 5.000000e-01 : f32
    %298 = vector.broadcast %cst_106 : f32 to vector<1x2xf32>
    %299 = arith.mulf %298, %297 : vector<1x2xf32>
    %300 = math.tanh %299 : vector<1x2xf32>
    %cst_107 = arith.constant 1.000000e+00 : f32
    %301 = vector.broadcast %cst_107 : f32 to vector<1x2xf32>
    %302 = arith.addf %300, %301 : vector<1x2xf32>
    %cst_108 = arith.constant 5.000000e-01 : f32
    %303 = vector.broadcast %cst_108 : f32 to vector<1x2xf32>
    %304 = arith.mulf %303, %302 : vector<1x2xf32>
    %c20_109 = arith.constant 20 : index
    %c0_110 = arith.constant 0 : index
    %305 = vector.load %arg4[%c20_109, %c0_110] : memref<32x2xf32, #tpu.memory_space<vmem>>, vector<1x2xf32>
    %306 = vector.broadcast %103 : f32 to vector<1x2xf32>
    %307 = arith.mulf %281, %306 : vector<1x2xf32>
    %308 = arith.addf %305, %307 : vector<1x2xf32>
    %309 = math.tanh %308 : vector<1x2xf32>
    %c28 = arith.constant 28 : index
    %c0_111 = arith.constant 0 : index
    %310 = vector.load %arg4[%c28, %c0_111] : memref<32x2xf32, #tpu.memory_space<vmem>>, vector<1x2xf32>
    %311 = vector.broadcast %104 : f32 to vector<1x2xf32>
    %312 = arith.mulf %281, %311 : vector<1x2xf32>
    %313 = arith.addf %310, %312 : vector<1x2xf32>
    %cst_112 = arith.constant 5.000000e-01 : f32
    %314 = vector.broadcast %cst_112 : f32 to vector<1x2xf32>
    %315 = arith.mulf %314, %313 : vector<1x2xf32>
    %316 = math.tanh %315 : vector<1x2xf32>
    %cst_113 = arith.constant 1.000000e+00 : f32
    %317 = vector.broadcast %cst_113 : f32 to vector<1x2xf32>
    %318 = arith.addf %316, %317 : vector<1x2xf32>
    %cst_114 = arith.constant 5.000000e-01 : f32
    %319 = vector.broadcast %cst_114 : f32 to vector<1x2xf32>
    %320 = arith.mulf %319, %318 : vector<1x2xf32>
    %321 = arith.mulf %304, %279 : vector<1x2xf32>
    %322 = arith.mulf %293, %309 : vector<1x2xf32>
    %323 = arith.addf %321, %322 : vector<1x2xf32>
    %324 = math.tanh %323 : vector<1x2xf32>
    %325 = arith.mulf %320, %324 : vector<1x2xf32>
    %c4_115 = arith.constant 4 : index
    %c0_116 = arith.constant 0 : index
    %326 = vector.load %arg5[%c4_115, %c0_116] : memref<8x2xf32, #tpu.memory_space<vmem>>, vector<1x2xf32>
    tpu.vector_store %arg5[%c4_115, %c0_116], %325 {strides = array<i32>} : memref<8x2xf32, #tpu.memory_space<vmem>>, vector<1x2xf32>,
    %c5_117 = arith.constant 5 : index
    %c0_118 = arith.constant 0 : index
    %327 = vector.load %arg4[%c5_117, %c0_118] : memref<32x2xf32, #tpu.memory_space<vmem>>, vector<1x2xf32>
    %328 = vector.broadcast %101 : f32 to vector<1x2xf32>
    %329 = arith.mulf %325, %328 : vector<1x2xf32>
    %330 = arith.addf %327, %329 : vector<1x2xf32>
    %cst_119 = arith.constant 5.000000e-01 : f32
    %331 = vector.broadcast %cst_119 : f32 to vector<1x2xf32>
    %332 = arith.mulf %331, %330 : vector<1x2xf32>
    %333 = math.tanh %332 : vector<1x2xf32>
    %cst_120 = arith.constant 1.000000e+00 : f32
    %334 = vector.broadcast %cst_120 : f32 to vector<1x2xf32>
    %335 = arith.addf %333, %334 : vector<1x2xf32>
    %cst_121 = arith.constant 5.000000e-01 : f32
    %336 = vector.broadcast %cst_121 : f32 to vector<1x2xf32>
    %337 = arith.mulf %336, %335 : vector<1x2xf32>
    %c13_122 = arith.constant 13 : index
    %c0_123 = arith.constant 0 : index
    %338 = vector.load %arg4[%c13_122, %c0_123] : memref<32x2xf32, #tpu.memory_space<vmem>>, vector<1x2xf32>
    %339 = vector.broadcast %102 : f32 to vector<1x2xf32>
    %340 = arith.mulf %325, %339 : vector<1x2xf32>
    %341 = arith.addf %338, %340 : vector<1x2xf32>
    %cst_124 = arith.constant 5.000000e-01 : f32
    %342 = vector.broadcast %cst_124 : f32 to vector<1x2xf32>
    %343 = arith.mulf %342, %341 : vector<1x2xf32>
    %344 = math.tanh %343 : vector<1x2xf32>
    %cst_125 = arith.constant 1.000000e+00 : f32
    %345 = vector.broadcast %cst_125 : f32 to vector<1x2xf32>
    %346 = arith.addf %344, %345 : vector<1x2xf32>
    %cst_126 = arith.constant 5.000000e-01 : f32
    %347 = vector.broadcast %cst_126 : f32 to vector<1x2xf32>
    %348 = arith.mulf %347, %346 : vector<1x2xf32>
    %c21_127 = arith.constant 21 : index
    %c0_128 = arith.constant 0 : index
    %349 = vector.load %arg4[%c21_127, %c0_128] : memref<32x2xf32, #tpu.memory_space<vmem>>, vector<1x2xf32>
    %350 = vector.broadcast %103 : f32 to vector<1x2xf32>
    %351 = arith.mulf %325, %350 : vector<1x2xf32>
    %352 = arith.addf %349, %351 : vector<1x2xf32>
    %353 = math.tanh %352 : vector<1x2xf32>
    %c29 = arith.constant 29 : index
    %c0_129 = arith.constant 0 : index
    %354 = vector.load %arg4[%c29, %c0_129] : memref<32x2xf32, #tpu.memory_space<vmem>>, vector<1x2xf32>
    %355 = vector.broadcast %104 : f32 to vector<1x2xf32>
    %356 = arith.mulf %325, %355 : vector<1x2xf32>
    %357 = arith.addf %354, %356 : vector<1x2xf32>
    %cst_130 = arith.constant 5.000000e-01 : f32
    %358 = vector.broadcast %cst_130 : f32 to vector<1x2xf32>
    %359 = arith.mulf %358, %357 : vector<1x2xf32>
    %360 = math.tanh %359 : vector<1x2xf32>
    %cst_131 = arith.constant 1.000000e+00 : f32
    %361 = vector.broadcast %cst_131 : f32 to vector<1x2xf32>
    %362 = arith.addf %360, %361 : vector<1x2xf32>
    %cst_132 = arith.constant 5.000000e-01 : f32
    %363 = vector.broadcast %cst_132 : f32 to vector<1x2xf32>
    %364 = arith.mulf %363, %362 : vector<1x2xf32>
    %365 = arith.mulf %348, %323 : vector<1x2xf32>
    %366 = arith.mulf %337, %353 : vector<1x2xf32>
    %367 = arith.addf %365, %366 : vector<1x2xf32>
    %368 = math.tanh %367 : vector<1x2xf32>
    %369 = arith.mulf %364, %368 : vector<1x2xf32>
    %c5_133 = arith.constant 5 : index
    %c0_134 = arith.constant 0 : index
    %370 = vector.load %arg5[%c5_133, %c0_134] : memref<8x2xf32, #tpu.memory_space<vmem>>, vector<1x2xf32>
    tpu.vector_store %arg5[%c5_133, %c0_134], %369 {strides = array<i32>} : memref<8x2xf32, #tpu.memory_space<vmem>>, vector<1x2xf32>,
    %c6_135 = arith.constant 6 : index
    %c0_136 = arith.constant 0 : index
    %371 = vector.load %arg4[%c6_135, %c0_136] : memref<32x2xf32, #tpu.memory_space<vmem>>, vector<1x2xf32>
    %372 = vector.broadcast %101 : f32 to vector<1x2xf32>
    %373 = arith.mulf %369, %372 : vector<1x2xf32>
    %374 = arith.addf %371, %373 : vector<1x2xf32>
    %cst_137 = arith.constant 5.000000e-01 : f32
    %375 = vector.broadcast %cst_137 : f32 to vector<1x2xf32>
    %376 = arith.mulf %375, %374 : vector<1x2xf32>
    %377 = math.tanh %376 : vector<1x2xf32>
    %cst_138 = arith.constant 1.000000e+00 : f32
    %378 = vector.broadcast %cst_138 : f32 to vector<1x2xf32>
    %379 = arith.addf %377, %378 : vector<1x2xf32>
    %cst_139 = arith.constant 5.000000e-01 : f32
    %380 = vector.broadcast %cst_139 : f32 to vector<1x2xf32>
    %381 = arith.mulf %380, %379 : vector<1x2xf32>
    %c14_140 = arith.constant 14 : index
    %c0_141 = arith.constant 0 : index
    %382 = vector.load %arg4[%c14_140, %c0_141] : memref<32x2xf32, #tpu.memory_space<vmem>>, vector<1x2xf32>
    %383 = vector.broadcast %102 : f32 to vector<1x2xf32>
    %384 = arith.mulf %369, %383 : vector<1x2xf32>
    %385 = arith.addf %382, %384 : vector<1x2xf32>
    %cst_142 = arith.constant 5.000000e-01 : f32
    %386 = vector.broadcast %cst_142 : f32 to vector<1x2xf32>
    %387 = arith.mulf %386, %385 : vector<1x2xf32>
    %388 = math.tanh %387 : vector<1x2xf32>
    %cst_143 = arith.constant 1.000000e+00 : f32
    %389 = vector.broadcast %cst_143 : f32 to vector<1x2xf32>
    %390 = arith.addf %388, %389 : vector<1x2xf32>
    %cst_144 = arith.constant 5.000000e-01 : f32
    %391 = vector.broadcast %cst_144 : f32 to vector<1x2xf32>
    %392 = arith.mulf %391, %390 : vector<1x2xf32>
    %c22_145 = arith.constant 22 : index
    %c0_146 = arith.constant 0 : index
    %393 = vector.load %arg4[%c22_145, %c0_146] : memref<32x2xf32, #tpu.memory_space<vmem>>, vector<1x2xf32>
    %394 = vector.broadcast %103 : f32 to vector<1x2xf32>
    %395 = arith.mulf %369, %394 : vector<1x2xf32>
    %396 = arith.addf %393, %395 : vector<1x2xf32>
    %397 = math.tanh %396 : vector<1x2xf32>
    %c30 = arith.constant 30 : index
    %c0_147 = arith.constant 0 : index
    %398 = vector.load %arg4[%c30, %c0_147] : memref<32x2xf32, #tpu.memory_space<vmem>>, vector<1x2xf32>
    %399 = vector.broadcast %104 : f32 to vector<1x2xf32>
    %400 = arith.mulf %369, %399 : vector<1x2xf32>
    %401 = arith.addf %398, %400 : vector<1x2xf32>
    %cst_148 = arith.constant 5.000000e-01 : f32
    %402 = vector.broadcast %cst_148 : f32 to vector<1x2xf32>
    %403 = arith.mulf %402, %401 : vector<1x2xf32>
    %404 = math.tanh %403 : vector<1x2xf32>
    %cst_149 = arith.constant 1.000000e+00 : f32
    %405 = vector.broadcast %cst_149 : f32 to vector<1x2xf32>
    %406 = arith.addf %404, %405 : vector<1x2xf32>
    %cst_150 = arith.constant 5.000000e-01 : f32
    %407 = vector.broadcast %cst_150 : f32 to vector<1x2xf32>
    %408 = arith.mulf %407, %406 : vector<1x2xf32>
    %409 = arith.mulf %392, %367 : vector<1x2xf32>
    %410 = arith.mulf %381, %397 : vector<1x2xf32>
    %411 = arith.addf %409, %410 : vector<1x2xf32>
    %412 = math.tanh %411 : vector<1x2xf32>
    %413 = arith.mulf %408, %412 : vector<1x2xf32>
    %c6_151 = arith.constant 6 : index
    %c0_152 = arith.constant 0 : index
    %414 = vector.load %arg5[%c6_151, %c0_152] : memref<8x2xf32, #tpu.memory_space<vmem>>, vector<1x2xf32>
    tpu.vector_store %arg5[%c6_151, %c0_152], %413 {strides = array<i32>} : memref<8x2xf32, #tpu.memory_space<vmem>>, vector<1x2xf32>,
    %c7_153 = arith.constant 7 : index
    %c0_154 = arith.constant 0 : index
    %415 = vector.load %arg4[%c7_153, %c0_154] : memref<32x2xf32, #tpu.memory_space<vmem>>, vector<1x2xf32>
    %416 = vector.broadcast %101 : f32 to vector<1x2xf32>
    %417 = arith.mulf %413, %416 : vector<1x2xf32>
    %418 = arith.addf %415, %417 : vector<1x2xf32>
    %cst_155 = arith.constant 5.000000e-01 : f32
    %419 = vector.broadcast %cst_155 : f32 to vector<1x2xf32>
    %420 = arith.mulf %419, %418 : vector<1x2xf32>
    %421 = math.tanh %420 : vector<1x2xf32>
    %cst_156 = arith.constant 1.000000e+00 : f32
    %422 = vector.broadcast %cst_156 : f32 to vector<1x2xf32>
    %423 = arith.addf %421, %422 : vector<1x2xf32>
    %cst_157 = arith.constant 5.000000e-01 : f32
    %424 = vector.broadcast %cst_157 : f32 to vector<1x2xf32>
    %425 = arith.mulf %424, %423 : vector<1x2xf32>
    %c15_158 = arith.constant 15 : index
    %c0_159 = arith.constant 0 : index
    %426 = vector.load %arg4[%c15_158, %c0_159] : memref<32x2xf32, #tpu.memory_space<vmem>>, vector<1x2xf32>
    %427 = vector.broadcast %102 : f32 to vector<1x2xf32>
    %428 = arith.mulf %413, %427 : vector<1x2xf32>
    %429 = arith.addf %426, %428 : vector<1x2xf32>
    %cst_160 = arith.constant 5.000000e-01 : f32
    %430 = vector.broadcast %cst_160 : f32 to vector<1x2xf32>
    %431 = arith.mulf %430, %429 : vector<1x2xf32>
    %432 = math.tanh %431 : vector<1x2xf32>
    %cst_161 = arith.constant 1.000000e+00 : f32
    %433 = vector.broadcast %cst_161 : f32 to vector<1x2xf32>
    %434 = arith.addf %432, %433 : vector<1x2xf32>
    %cst_162 = arith.constant 5.000000e-01 : f32
    %435 = vector.broadcast %cst_162 : f32 to vector<1x2xf32>
    %436 = arith.mulf %435, %434 : vector<1x2xf32>
    %c23_163 = arith.constant 23 : index
    %c0_164 = arith.constant 0 : index
    %437 = vector.load %arg4[%c23_163, %c0_164] : memref<32x2xf32, #tpu.memory_space<vmem>>, vector<1x2xf32>
    %438 = vector.broadcast %103 : f32 to vector<1x2xf32>
    %439 = arith.mulf %413, %438 : vector<1x2xf32>
    %440 = arith.addf %437, %439 : vector<1x2xf32>
    %441 = math.tanh %440 : vector<1x2xf32>
    %c31 = arith.constant 31 : index
    %c0_165 = arith.constant 0 : index
    %442 = vector.load %arg4[%c31, %c0_165] : memref<32x2xf32, #tpu.memory_space<vmem>>, vector<1x2xf32>
    %443 = vector.broadcast %104 : f32 to vector<1x2xf32>
    %444 = arith.mulf %413, %443 : vector<1x2xf32>
    %445 = arith.addf %442, %444 : vector<1x2xf32>
    %cst_166 = arith.constant 5.000000e-01 : f32
    %446 = vector.broadcast %cst_166 : f32 to vector<1x2xf32>
    %447 = arith.mulf %446, %445 : vector<1x2xf32>
    %448 = math.tanh %447 : vector<1x2xf32>
    %cst_167 = arith.constant 1.000000e+00 : f32
    %449 = vector.broadcast %cst_167 : f32 to vector<1x2xf32>
    %450 = arith.addf %448, %449 : vector<1x2xf32>
    %cst_168 = arith.constant 5.000000e-01 : f32
    %451 = vector.broadcast %cst_168 : f32 to vector<1x2xf32>
    %452 = arith.mulf %451, %450 : vector<1x2xf32>
    %453 = arith.mulf %436, %411 : vector<1x2xf32>
    %454 = arith.mulf %425, %441 : vector<1x2xf32>
    %455 = arith.addf %453, %454 : vector<1x2xf32>
    %456 = math.tanh %455 : vector<1x2xf32>
    %457 = arith.mulf %452, %456 : vector<1x2xf32>
    %c7_169 = arith.constant 7 : index
    %c0_170 = arith.constant 0 : index
    %458 = vector.load %arg5[%c7_169, %c0_170] : memref<8x2xf32, #tpu.memory_space<vmem>>, vector<1x2xf32>
    tpu.vector_store %arg5[%c7_169, %c0_170], %457 {strides = array<i32>} : memref<8x2xf32, #tpu.memory_space<vmem>>, vector<1x2xf32>,
    %c0_171 = arith.constant 0 : index
    %c0_172 = arith.constant 0 : index
    %459 = vector.load %arg5[%c0_171, %c0_172] : memref<8x2xf32, #tpu.memory_space<vmem>>, vector<8x2xf32>
    %c28_173 = arith.constant 28 : index
    %460 = memref.load %arg2[%c28_173] : memref<58xf32, #tpu.memory_space<smem>>
    %461 = vector.broadcast %460 : f32 to vector<8x2xf32>
    %462 = arith.mulf %459, %461 : vector<8x2xf32>
    %c52 = arith.constant 52 : index
    %463 = memref.load %arg2[%c52] : memref<58xf32, #tpu.memory_space<smem>>
    %464 = vector.broadcast %463 : f32 to vector<8x2xf32>
    %465 = arith.addf %462, %464 : vector<8x2xf32>
    %c36 = arith.constant 36 : index
    %466 = memref.load %arg2[%c36] : memref<58xf32, #tpu.memory_space<smem>>
    %467 = vector.broadcast %466 : f32 to vector<8x2xf32>
    %468 = arith.mulf %2, %467 : vector<8x2xf32>
    %469 = arith.addf %465, %468 : vector<8x2xf32>
    %c40 = arith.constant 40 : index
    %470 = memref.load %arg2[%c40] : memref<58xf32, #tpu.memory_space<smem>>
    %471 = vector.broadcast %470 : f32 to vector<8x2xf32>
    %472 = arith.mulf %4, %471 : vector<8x2xf32>
    %473 = arith.addf %469, %472 : vector<8x2xf32>
    %c44 = arith.constant 44 : index
    %474 = memref.load %arg2[%c44] : memref<58xf32, #tpu.memory_space<smem>>
    %475 = vector.broadcast %474 : f32 to vector<8x2xf32>
    %476 = arith.mulf %6, %475 : vector<8x2xf32>
    %477 = arith.addf %473, %476 : vector<8x2xf32>
    %c48 = arith.constant 48 : index
    %478 = memref.load %arg2[%c48] : memref<58xf32, #tpu.memory_space<smem>>
    %479 = vector.broadcast %478 : f32 to vector<8x2xf32>
    %480 = arith.mulf %8, %479 : vector<8x2xf32>
    %481 = arith.addf %477, %480 : vector<8x2xf32>
    %c0_174 = arith.constant 0 : index
    %c0_175 = arith.constant 0 : index
    %482 = vector.load %arg6[%c0_174, %c0_175] : memref<32x2xf32, #tpu.memory_space<vmem>>, vector<8x2xf32>
    tpu.vector_store %arg6[%c0_174, %c0_175], %481 {strides = array<i32>} : memref<32x2xf32, #tpu.memory_space<vmem>>, vector<8x2xf32>,
    %c29_176 = arith.constant 29 : index
    %483 = memref.load %arg2[%c29_176] : memref<58xf32, #tpu.memory_space<smem>>
    %484 = vector.broadcast %483 : f32 to vector<8x2xf32>
    %485 = arith.mulf %459, %484 : vector<8x2xf32>
    %c53 = arith.constant 53 : index
    %486 = memref.load %arg2[%c53] : memref<58xf32, #tpu.memory_space<smem>>
    %487 = vector.broadcast %486 : f32 to vector<8x2xf32>
    %488 = arith.addf %485, %487 : vector<8x2xf32>
    %c37 = arith.constant 37 : index
    %489 = memref.load %arg2[%c37] : memref<58xf32, #tpu.memory_space<smem>>
    %490 = vector.broadcast %489 : f32 to vector<8x2xf32>
    %491 = arith.mulf %2, %490 : vector<8x2xf32>
    %492 = arith.addf %488, %491 : vector<8x2xf32>
    %c41 = arith.constant 41 : index
    %493 = memref.load %arg2[%c41] : memref<58xf32, #tpu.memory_space<smem>>
    %494 = vector.broadcast %493 : f32 to vector<8x2xf32>
    %495 = arith.mulf %4, %494 : vector<8x2xf32>
    %496 = arith.addf %492, %495 : vector<8x2xf32>
    %c45 = arith.constant 45 : index
    %497 = memref.load %arg2[%c45] : memref<58xf32, #tpu.memory_space<smem>>
    %498 = vector.broadcast %497 : f32 to vector<8x2xf32>
    %499 = arith.mulf %6, %498 : vector<8x2xf32>
    %500 = arith.addf %496, %499 : vector<8x2xf32>
    %c49 = arith.constant 49 : index
    %501 = memref.load %arg2[%c49] : memref<58xf32, #tpu.memory_space<smem>>
    %502 = vector.broadcast %501 : f32 to vector<8x2xf32>
    %503 = arith.mulf %8, %502 : vector<8x2xf32>
    %504 = arith.addf %500, %503 : vector<8x2xf32>
    %c8_177 = arith.constant 8 : index
    %c0_178 = arith.constant 0 : index
    %505 = vector.load %arg6[%c8_177, %c0_178] : memref<32x2xf32, #tpu.memory_space<vmem>>, vector<8x2xf32>
    tpu.vector_store %arg6[%c8_177, %c0_178], %504 {strides = array<i32>} : memref<32x2xf32, #tpu.memory_space<vmem>>, vector<8x2xf32>,
    %c30_179 = arith.constant 30 : index
    %506 = memref.load %arg2[%c30_179] : memref<58xf32, #tpu.memory_space<smem>>
    %507 = vector.broadcast %506 : f32 to vector<8x2xf32>
    %508 = arith.mulf %459, %507 : vector<8x2xf32>
    %c54 = arith.constant 54 : index
    %509 = memref.load %arg2[%c54] : memref<58xf32, #tpu.memory_space<smem>>
    %510 = vector.broadcast %509 : f32 to vector<8x2xf32>
    %511 = arith.addf %508, %510 : vector<8x2xf32>
    %c38 = arith.constant 38 : index
    %512 = memref.load %arg2[%c38] : memref<58xf32, #tpu.memory_space<smem>>
    %513 = vector.broadcast %512 : f32 to vector<8x2xf32>
    %514 = arith.mulf %2, %513 : vector<8x2xf32>
    %515 = arith.addf %511, %514 : vector<8x2xf32>
    %c42 = arith.constant 42 : index
    %516 = memref.load %arg2[%c42] : memref<58xf32, #tpu.memory_space<smem>>
    %517 = vector.broadcast %516 : f32 to vector<8x2xf32>
    %518 = arith.mulf %4, %517 : vector<8x2xf32>
    %519 = arith.addf %515, %518 : vector<8x2xf32>
    %c46 = arith.constant 46 : index
    %520 = memref.load %arg2[%c46] : memref<58xf32, #tpu.memory_space<smem>>
    %521 = vector.broadcast %520 : f32 to vector<8x2xf32>
    %522 = arith.mulf %6, %521 : vector<8x2xf32>
    %523 = arith.addf %519, %522 : vector<8x2xf32>
    %c50 = arith.constant 50 : index
    %524 = memref.load %arg2[%c50] : memref<58xf32, #tpu.memory_space<smem>>
    %525 = vector.broadcast %524 : f32 to vector<8x2xf32>
    %526 = arith.mulf %8, %525 : vector<8x2xf32>
    %527 = arith.addf %523, %526 : vector<8x2xf32>
    %c16_180 = arith.constant 16 : index
    %c0_181 = arith.constant 0 : index
    %528 = vector.load %arg6[%c16_180, %c0_181] : memref<32x2xf32, #tpu.memory_space<vmem>>, vector<8x2xf32>
    tpu.vector_store %arg6[%c16_180, %c0_181], %527 {strides = array<i32>} : memref<32x2xf32, #tpu.memory_space<vmem>>, vector<8x2xf32>,
    %c31_182 = arith.constant 31 : index
    %529 = memref.load %arg2[%c31_182] : memref<58xf32, #tpu.memory_space<smem>>
    %530 = vector.broadcast %529 : f32 to vector<8x2xf32>
    %531 = arith.mulf %459, %530 : vector<8x2xf32>
    %c55 = arith.constant 55 : index
    %532 = memref.load %arg2[%c55] : memref<58xf32, #tpu.memory_space<smem>>
    %533 = vector.broadcast %532 : f32 to vector<8x2xf32>
    %534 = arith.addf %531, %533 : vector<8x2xf32>
    %c39 = arith.constant 39 : index
    %535 = memref.load %arg2[%c39] : memref<58xf32, #tpu.memory_space<smem>>
    %536 = vector.broadcast %535 : f32 to vector<8x2xf32>
    %537 = arith.mulf %2, %536 : vector<8x2xf32>
    %538 = arith.addf %534, %537 : vector<8x2xf32>
    %c43 = arith.constant 43 : index
    %539 = memref.load %arg2[%c43] : memref<58xf32, #tpu.memory_space<smem>>
    %540 = vector.broadcast %539 : f32 to vector<8x2xf32>
    %541 = arith.mulf %4, %540 : vector<8x2xf32>
    %542 = arith.addf %538, %541 : vector<8x2xf32>
    %c47 = arith.constant 47 : index
    %543 = memref.load %arg2[%c47] : memref<58xf32, #tpu.memory_space<smem>>
    %544 = vector.broadcast %543 : f32 to vector<8x2xf32>
    %545 = arith.mulf %6, %544 : vector<8x2xf32>
    %546 = arith.addf %542, %545 : vector<8x2xf32>
    %c51 = arith.constant 51 : index
    %547 = memref.load %arg2[%c51] : memref<58xf32, #tpu.memory_space<smem>>
    %548 = vector.broadcast %547 : f32 to vector<8x2xf32>
    %549 = arith.mulf %8, %548 : vector<8x2xf32>
    %550 = arith.addf %546, %549 : vector<8x2xf32>
    %c24_183 = arith.constant 24 : index
    %c0_184 = arith.constant 0 : index
    %551 = vector.load %arg6[%c24_183, %c0_184] : memref<32x2xf32, #tpu.memory_space<vmem>>, vector<8x2xf32>
    tpu.vector_store %arg6[%c24_183, %c0_184], %550 {strides = array<i32>} : memref<32x2xf32, #tpu.memory_space<vmem>>, vector<8x2xf32>,
    %c56 = arith.constant 56 : index
    %552 = memref.load %arg2[%c56] : memref<58xf32, #tpu.memory_space<smem>>
    %c57 = arith.constant 57 : index
    %553 = memref.load %arg2[%c57] : memref<58xf32, #tpu.memory_space<smem>>
    %c32 = arith.constant 32 : index
    %554 = memref.load %arg2[%c32] : memref<58xf32, #tpu.memory_space<smem>>
    %c33 = arith.constant 33 : index
    %555 = memref.load %arg2[%c33] : memref<58xf32, #tpu.memory_space<smem>>
    %c34 = arith.constant 34 : index
    %556 = memref.load %arg2[%c34] : memref<58xf32, #tpu.memory_space<smem>>
    %c35 = arith.constant 35 : index
    %557 = memref.load %arg2[%c35] : memref<58xf32, #tpu.memory_space<smem>>
    %cst_185 = arith.constant 0.000000e+00 : f32
    %558 = vector.broadcast %cst_185 : f32 to vector<1x2xf32>
    %cst_186 = arith.constant 0.000000e+00 : f32
    %559 = vector.broadcast %cst_186 : f32 to vector<1x2xf32>
    %c0_187 = arith.constant 0 : index
    %c0_188 = arith.constant 0 : index
    %560 = vector.load %arg6[%c0_187, %c0_188] : memref<32x2xf32, #tpu.memory_space<vmem>>, vector<1x2xf32>
    %561 = vector.broadcast %554 : f32 to vector<1x2xf32>
    %562 = arith.mulf %558, %561 : vector<1x2xf32>
    %563 = arith.addf %560, %562 : vector<1x2xf32>
    %cst_189 = arith.constant 5.000000e-01 : f32
    %564 = vector.broadcast %cst_189 : f32 to vector<1x2xf32>
    %565 = arith.mulf %564, %563 : vector<1x2xf32>
    %566 = math.tanh %565 : vector<1x2xf32>
    %cst_190 = arith.constant 1.000000e+00 : f32
    %567 = vector.broadcast %cst_190 : f32 to vector<1x2xf32>
    %568 = arith.addf %566, %567 : vector<1x2xf32>
    %cst_191 = arith.constant 5.000000e-01 : f32
    %569 = vector.broadcast %cst_191 : f32 to vector<1x2xf32>
    %570 = arith.mulf %569, %568 : vector<1x2xf32>
    %c8_192 = arith.constant 8 : index
    %c0_193 = arith.constant 0 : index
    %571 = vector.load %arg6[%c8_192, %c0_193] : memref<32x2xf32, #tpu.memory_space<vmem>>, vector<1x2xf32>
    %572 = vector.broadcast %555 : f32 to vector<1x2xf32>
    %573 = arith.mulf %558, %572 : vector<1x2xf32>
    %574 = arith.addf %571, %573 : vector<1x2xf32>
    %cst_194 = arith.constant 5.000000e-01 : f32
    %575 = vector.broadcast %cst_194 : f32 to vector<1x2xf32>
    %576 = arith.mulf %575, %574 : vector<1x2xf32>
    %577 = math.tanh %576 : vector<1x2xf32>
    %cst_195 = arith.constant 1.000000e+00 : f32
    %578 = vector.broadcast %cst_195 : f32 to vector<1x2xf32>
    %579 = arith.addf %577, %578 : vector<1x2xf32>
    %cst_196 = arith.constant 5.000000e-01 : f32
    %580 = vector.broadcast %cst_196 : f32 to vector<1x2xf32>
    %581 = arith.mulf %580, %579 : vector<1x2xf32>
    %c16_197 = arith.constant 16 : index
    %c0_198 = arith.constant 0 : index
    %582 = vector.load %arg6[%c16_197, %c0_198] : memref<32x2xf32, #tpu.memory_space<vmem>>, vector<1x2xf32>
    %583 = vector.broadcast %556 : f32 to vector<1x2xf32>
    %584 = arith.mulf %558, %583 : vector<1x2xf32>
    %585 = arith.addf %582, %584 : vector<1x2xf32>
    %586 = math.tanh %585 : vector<1x2xf32>
    %c24_199 = arith.constant 24 : index
    %c0_200 = arith.constant 0 : index
    %587 = vector.load %arg6[%c24_199, %c0_200] : memref<32x2xf32, #tpu.memory_space<vmem>>, vector<1x2xf32>
    %588 = vector.broadcast %557 : f32 to vector<1x2xf32>
    %589 = arith.mulf %558, %588 : vector<1x2xf32>
    %590 = arith.addf %587, %589 : vector<1x2xf32>
    %cst_201 = arith.constant 5.000000e-01 : f32
    %591 = vector.broadcast %cst_201 : f32 to vector<1x2xf32>
    %592 = arith.mulf %591, %590 : vector<1x2xf32>
    %593 = math.tanh %592 : vector<1x2xf32>
    %cst_202 = arith.constant 1.000000e+00 : f32
    %594 = vector.broadcast %cst_202 : f32 to vector<1x2xf32>
    %595 = arith.addf %593, %594 : vector<1x2xf32>
    %cst_203 = arith.constant 5.000000e-01 : f32
    %596 = vector.broadcast %cst_203 : f32 to vector<1x2xf32>
    %597 = arith.mulf %596, %595 : vector<1x2xf32>
    %598 = arith.mulf %581, %559 : vector<1x2xf32>
    %599 = arith.mulf %570, %586 : vector<1x2xf32>
    %600 = arith.addf %598, %599 : vector<1x2xf32>
    %601 = math.tanh %600 : vector<1x2xf32>
    %602 = arith.mulf %597, %601 : vector<1x2xf32>
    %603 = vector.broadcast %552 : f32 to vector<1x2xf32>
    %604 = arith.mulf %602, %603 : vector<1x2xf32>
    %605 = vector.broadcast %553 : f32 to vector<1x2xf32>
    %606 = arith.addf %604, %605 : vector<1x2xf32>
    %c0_204 = arith.constant 0 : index
    %c0_205 = arith.constant 0 : index
    %607 = vector.load %arg3[%c0_204, %c0_205] : memref<8x2xf32, #tpu.memory_space<vmem>>, vector<1x2xf32>
    tpu.vector_store %arg3[%c0_204, %c0_205], %606 {strides = array<i32>} : memref<8x2xf32, #tpu.memory_space<vmem>>, vector<1x2xf32>,
    %c1_206 = arith.constant 1 : index
    %c0_207 = arith.constant 0 : index
    %608 = vector.load %arg6[%c1_206, %c0_207] : memref<32x2xf32, #tpu.memory_space<vmem>>, vector<1x2xf32>
    %609 = vector.broadcast %554 : f32 to vector<1x2xf32>
    %610 = arith.mulf %602, %609 : vector<1x2xf32>
    %611 = arith.addf %608, %610 : vector<1x2xf32>
    %cst_208 = arith.constant 5.000000e-01 : f32
    %612 = vector.broadcast %cst_208 : f32 to vector<1x2xf32>
    %613 = arith.mulf %612, %611 : vector<1x2xf32>
    %614 = math.tanh %613 : vector<1x2xf32>
    %cst_209 = arith.constant 1.000000e+00 : f32
    %615 = vector.broadcast %cst_209 : f32 to vector<1x2xf32>
    %616 = arith.addf %614, %615 : vector<1x2xf32>
    %cst_210 = arith.constant 5.000000e-01 : f32
    %617 = vector.broadcast %cst_210 : f32 to vector<1x2xf32>
    %618 = arith.mulf %617, %616 : vector<1x2xf32>
    %c9_211 = arith.constant 9 : index
    %c0_212 = arith.constant 0 : index
    %619 = vector.load %arg6[%c9_211, %c0_212] : memref<32x2xf32, #tpu.memory_space<vmem>>, vector<1x2xf32>
    %620 = vector.broadcast %555 : f32 to vector<1x2xf32>
    %621 = arith.mulf %602, %620 : vector<1x2xf32>
    %622 = arith.addf %619, %621 : vector<1x2xf32>
    %cst_213 = arith.constant 5.000000e-01 : f32
    %623 = vector.broadcast %cst_213 : f32 to vector<1x2xf32>
    %624 = arith.mulf %623, %622 : vector<1x2xf32>
    %625 = math.tanh %624 : vector<1x2xf32>
    %cst_214 = arith.constant 1.000000e+00 : f32
    %626 = vector.broadcast %cst_214 : f32 to vector<1x2xf32>
    %627 = arith.addf %625, %626 : vector<1x2xf32>
    %cst_215 = arith.constant 5.000000e-01 : f32
    %628 = vector.broadcast %cst_215 : f32 to vector<1x2xf32>
    %629 = arith.mulf %628, %627 : vector<1x2xf32>
    %c17_216 = arith.constant 17 : index
    %c0_217 = arith.constant 0 : index
    %630 = vector.load %arg6[%c17_216, %c0_217] : memref<32x2xf32, #tpu.memory_space<vmem>>, vector<1x2xf32>
    %631 = vector.broadcast %556 : f32 to vector<1x2xf32>
    %632 = arith.mulf %602, %631 : vector<1x2xf32>
    %633 = arith.addf %630, %632 : vector<1x2xf32>
    %634 = math.tanh %633 : vector<1x2xf32>
    %c25_218 = arith.constant 25 : index
    %c0_219 = arith.constant 0 : index
    %635 = vector.load %arg6[%c25_218, %c0_219] : memref<32x2xf32, #tpu.memory_space<vmem>>, vector<1x2xf32>
    %636 = vector.broadcast %557 : f32 to vector<1x2xf32>
    %637 = arith.mulf %602, %636 : vector<1x2xf32>
    %638 = arith.addf %635, %637 : vector<1x2xf32>
    %cst_220 = arith.constant 5.000000e-01 : f32
    %639 = vector.broadcast %cst_220 : f32 to vector<1x2xf32>
    %640 = arith.mulf %639, %638 : vector<1x2xf32>
    %641 = math.tanh %640 : vector<1x2xf32>
    %cst_221 = arith.constant 1.000000e+00 : f32
    %642 = vector.broadcast %cst_221 : f32 to vector<1x2xf32>
    %643 = arith.addf %641, %642 : vector<1x2xf32>
    %cst_222 = arith.constant 5.000000e-01 : f32
    %644 = vector.broadcast %cst_222 : f32 to vector<1x2xf32>
    %645 = arith.mulf %644, %643 : vector<1x2xf32>
    %646 = arith.mulf %629, %600 : vector<1x2xf32>
    %647 = arith.mulf %618, %634 : vector<1x2xf32>
    %648 = arith.addf %646, %647 : vector<1x2xf32>
    %649 = math.tanh %648 : vector<1x2xf32>
    %650 = arith.mulf %645, %649 : vector<1x2xf32>
    %651 = vector.broadcast %552 : f32 to vector<1x2xf32>
    %652 = arith.mulf %650, %651 : vector<1x2xf32>
    %653 = vector.broadcast %553 : f32 to vector<1x2xf32>
    %654 = arith.addf %652, %653 : vector<1x2xf32>
    %c1_223 = arith.constant 1 : index
    %c0_224 = arith.constant 0 : index
    %655 = vector.load %arg3[%c1_223, %c0_224] : memref<8x2xf32, #tpu.memory_space<vmem>>, vector<1x2xf32>
    tpu.vector_store %arg3[%c1_223, %c0_224], %654 {strides = array<i32>} : memref<8x2xf32, #tpu.memory_space<vmem>>, vector<1x2xf32>,
    %c2_225 = arith.constant 2 : index
    %c0_226 = arith.constant 0 : index
    %656 = vector.load %arg6[%c2_225, %c0_226] : memref<32x2xf32, #tpu.memory_space<vmem>>, vector<1x2xf32>
    %657 = vector.broadcast %554 : f32 to vector<1x2xf32>
    %658 = arith.mulf %650, %657 : vector<1x2xf32>
    %659 = arith.addf %656, %658 : vector<1x2xf32>
    %cst_227 = arith.constant 5.000000e-01 : f32
    %660 = vector.broadcast %cst_227 : f32 to vector<1x2xf32>
    %661 = arith.mulf %660, %659 : vector<1x2xf32>
    %662 = math.tanh %661 : vector<1x2xf32>
    %cst_228 = arith.constant 1.000000e+00 : f32
    %663 = vector.broadcast %cst_228 : f32 to vector<1x2xf32>
    %664 = arith.addf %662, %663 : vector<1x2xf32>
    %cst_229 = arith.constant 5.000000e-01 : f32
    %665 = vector.broadcast %cst_229 : f32 to vector<1x2xf32>
    %666 = arith.mulf %665, %664 : vector<1x2xf32>
    %c10_230 = arith.constant 10 : index
    %c0_231 = arith.constant 0 : index
    %667 = vector.load %arg6[%c10_230, %c0_231] : memref<32x2xf32, #tpu.memory_space<vmem>>, vector<1x2xf32>
    %668 = vector.broadcast %555 : f32 to vector<1x2xf32>
    %669 = arith.mulf %650, %668 : vector<1x2xf32>
    %670 = arith.addf %667, %669 : vector<1x2xf32>
    %cst_232 = arith.constant 5.000000e-01 : f32
    %671 = vector.broadcast %cst_232 : f32 to vector<1x2xf32>
    %672 = arith.mulf %671, %670 : vector<1x2xf32>
    %673 = math.tanh %672 : vector<1x2xf32>
    %cst_233 = arith.constant 1.000000e+00 : f32
    %674 = vector.broadcast %cst_233 : f32 to vector<1x2xf32>
    %675 = arith.addf %673, %674 : vector<1x2xf32>
    %cst_234 = arith.constant 5.000000e-01 : f32
    %676 = vector.broadcast %cst_234 : f32 to vector<1x2xf32>
    %677 = arith.mulf %676, %675 : vector<1x2xf32>
    %c18_235 = arith.constant 18 : index
    %c0_236 = arith.constant 0 : index
    %678 = vector.load %arg6[%c18_235, %c0_236] : memref<32x2xf32, #tpu.memory_space<vmem>>, vector<1x2xf32>
    %679 = vector.broadcast %556 : f32 to vector<1x2xf32>
    %680 = arith.mulf %650, %679 : vector<1x2xf32>
    %681 = arith.addf %678, %680 : vector<1x2xf32>
    %682 = math.tanh %681 : vector<1x2xf32>
    %c26_237 = arith.constant 26 : index
    %c0_238 = arith.constant 0 : index
    %683 = vector.load %arg6[%c26_237, %c0_238] : memref<32x2xf32, #tpu.memory_space<vmem>>, vector<1x2xf32>
    %684 = vector.broadcast %557 : f32 to vector<1x2xf32>
    %685 = arith.mulf %650, %684 : vector<1x2xf32>
    %686 = arith.addf %683, %685 : vector<1x2xf32>
    %cst_239 = arith.constant 5.000000e-01 : f32
    %687 = vector.broadcast %cst_239 : f32 to vector<1x2xf32>
    %688 = arith.mulf %687, %686 : vector<1x2xf32>
    %689 = math.tanh %688 : vector<1x2xf32>
    %cst_240 = arith.constant 1.000000e+00 : f32
    %690 = vector.broadcast %cst_240 : f32 to vector<1x2xf32>
    %691 = arith.addf %689, %690 : vector<1x2xf32>
    %cst_241 = arith.constant 5.000000e-01 : f32
    %692 = vector.broadcast %cst_241 : f32 to vector<1x2xf32>
    %693 = arith.mulf %692, %691 : vector<1x2xf32>
    %694 = arith.mulf %677, %648 : vector<1x2xf32>
    %695 = arith.mulf %666, %682 : vector<1x2xf32>
    %696 = arith.addf %694, %695 : vector<1x2xf32>
    %697 = math.tanh %696 : vector<1x2xf32>
    %698 = arith.mulf %693, %697 : vector<1x2xf32>
    %699 = vector.broadcast %552 : f32 to vector<1x2xf32>
    %700 = arith.mulf %698, %699 : vector<1x2xf32>
    %701 = vector.broadcast %553 : f32 to vector<1x2xf32>
    %702 = arith.addf %700, %701 : vector<1x2xf32>
    %c2_242 = arith.constant 2 : index
    %c0_243 = arith.constant 0 : index
    %703 = vector.load %arg3[%c2_242, %c0_243] : memref<8x2xf32, #tpu.memory_space<vmem>>, vector<1x2xf32>
    tpu.vector_store %arg3[%c2_242, %c0_243], %702 {strides = array<i32>} : memref<8x2xf32, #tpu.memory_space<vmem>>, vector<1x2xf32>,
    %c3_244 = arith.constant 3 : index
    %c0_245 = arith.constant 0 : index
    %704 = vector.load %arg6[%c3_244, %c0_245] : memref<32x2xf32, #tpu.memory_space<vmem>>, vector<1x2xf32>
    %705 = vector.broadcast %554 : f32 to vector<1x2xf32>
    %706 = arith.mulf %698, %705 : vector<1x2xf32>
    %707 = arith.addf %704, %706 : vector<1x2xf32>
    %cst_246 = arith.constant 5.000000e-01 : f32
    %708 = vector.broadcast %cst_246 : f32 to vector<1x2xf32>
    %709 = arith.mulf %708, %707 : vector<1x2xf32>
    %710 = math.tanh %709 : vector<1x2xf32>
    %cst_247 = arith.constant 1.000000e+00 : f32
    %711 = vector.broadcast %cst_247 : f32 to vector<1x2xf32>
    %712 = arith.addf %710, %711 : vector<1x2xf32>
    %cst_248 = arith.constant 5.000000e-01 : f32
    %713 = vector.broadcast %cst_248 : f32 to vector<1x2xf32>
    %714 = arith.mulf %713, %712 : vector<1x2xf32>
    %c11_249 = arith.constant 11 : index
    %c0_250 = arith.constant 0 : index
    %715 = vector.load %arg6[%c11_249, %c0_250] : memref<32x2xf32, #tpu.memory_space<vmem>>, vector<1x2xf32>
    %716 = vector.broadcast %555 : f32 to vector<1x2xf32>
    %717 = arith.mulf %698, %716 : vector<1x2xf32>
    %718 = arith.addf %715, %717 : vector<1x2xf32>
    %cst_251 = arith.constant 5.000000e-01 : f32
    %719 = vector.broadcast %cst_251 : f32 to vector<1x2xf32>
    %720 = arith.mulf %719, %718 : vector<1x2xf32>
    %721 = math.tanh %720 : vector<1x2xf32>
    %cst_252 = arith.constant 1.000000e+00 : f32
    %722 = vector.broadcast %cst_252 : f32 to vector<1x2xf32>
    %723 = arith.addf %721, %722 : vector<1x2xf32>
    %cst_253 = arith.constant 5.000000e-01 : f32
    %724 = vector.broadcast %cst_253 : f32 to vector<1x2xf32>
    %725 = arith.mulf %724, %723 : vector<1x2xf32>
    %c19_254 = arith.constant 19 : index
    %c0_255 = arith.constant 0 : index
    %726 = vector.load %arg6[%c19_254, %c0_255] : memref<32x2xf32, #tpu.memory_space<vmem>>, vector<1x2xf32>
    %727 = vector.broadcast %556 : f32 to vector<1x2xf32>
    %728 = arith.mulf %698, %727 : vector<1x2xf32>
    %729 = arith.addf %726, %728 : vector<1x2xf32>
    %730 = math.tanh %729 : vector<1x2xf32>
    %c27_256 = arith.constant 27 : index
    %c0_257 = arith.constant 0 : index
    %731 = vector.load %arg6[%c27_256, %c0_257] : memref<32x2xf32, #tpu.memory_space<vmem>>, vector<1x2xf32>
    %732 = vector.broadcast %557 : f32 to vector<1x2xf32>
    %733 = arith.mulf %698, %732 : vector<1x2xf32>
    %734 = arith.addf %731, %733 : vector<1x2xf32>
    %cst_258 = arith.constant 5.000000e-01 : f32
    %735 = vector.broadcast %cst_258 : f32 to vector<1x2xf32>
    %736 = arith.mulf %735, %734 : vector<1x2xf32>
    %737 = math.tanh %736 : vector<1x2xf32>
    %cst_259 = arith.constant 1.000000e+00 : f32
    %738 = vector.broadcast %cst_259 : f32 to vector<1x2xf32>
    %739 = arith.addf %737, %738 : vector<1x2xf32>
    %cst_260 = arith.constant 5.000000e-01 : f32
    %740 = vector.broadcast %cst_260 : f32 to vector<1x2xf32>
    %741 = arith.mulf %740, %739 : vector<1x2xf32>
    %742 = arith.mulf %725, %696 : vector<1x2xf32>
    %743 = arith.mulf %714, %730 : vector<1x2xf32>
    %744 = arith.addf %742, %743 : vector<1x2xf32>
    %745 = math.tanh %744 : vector<1x2xf32>
    %746 = arith.mulf %741, %745 : vector<1x2xf32>
    %747 = vector.broadcast %552 : f32 to vector<1x2xf32>
    %748 = arith.mulf %746, %747 : vector<1x2xf32>
    %749 = vector.broadcast %553 : f32 to vector<1x2xf32>
    %750 = arith.addf %748, %749 : vector<1x2xf32>
    %c3_261 = arith.constant 3 : index
    %c0_262 = arith.constant 0 : index
    %751 = vector.load %arg3[%c3_261, %c0_262] : memref<8x2xf32, #tpu.memory_space<vmem>>, vector<1x2xf32>
    tpu.vector_store %arg3[%c3_261, %c0_262], %750 {strides = array<i32>} : memref<8x2xf32, #tpu.memory_space<vmem>>, vector<1x2xf32>,
    %c4_263 = arith.constant 4 : index
    %c0_264 = arith.constant 0 : index
    %752 = vector.load %arg6[%c4_263, %c0_264] : memref<32x2xf32, #tpu.memory_space<vmem>>, vector<1x2xf32>
    %753 = vector.broadcast %554 : f32 to vector<1x2xf32>
    %754 = arith.mulf %746, %753 : vector<1x2xf32>
    %755 = arith.addf %752, %754 : vector<1x2xf32>
    %cst_265 = arith.constant 5.000000e-01 : f32
    %756 = vector.broadcast %cst_265 : f32 to vector<1x2xf32>
    %757 = arith.mulf %756, %755 : vector<1x2xf32>
    %758 = math.tanh %757 : vector<1x2xf32>
    %cst_266 = arith.constant 1.000000e+00 : f32
    %759 = vector.broadcast %cst_266 : f32 to vector<1x2xf32>
    %760 = arith.addf %758, %759 : vector<1x2xf32>
    %cst_267 = arith.constant 5.000000e-01 : f32
    %761 = vector.broadcast %cst_267 : f32 to vector<1x2xf32>
    %762 = arith.mulf %761, %760 : vector<1x2xf32>
    %c12_268 = arith.constant 12 : index
    %c0_269 = arith.constant 0 : index
    %763 = vector.load %arg6[%c12_268, %c0_269] : memref<32x2xf32, #tpu.memory_space<vmem>>, vector<1x2xf32>
    %764 = vector.broadcast %555 : f32 to vector<1x2xf32>
    %765 = arith.mulf %746, %764 : vector<1x2xf32>
    %766 = arith.addf %763, %765 : vector<1x2xf32>
    %cst_270 = arith.constant 5.000000e-01 : f32
    %767 = vector.broadcast %cst_270 : f32 to vector<1x2xf32>
    %768 = arith.mulf %767, %766 : vector<1x2xf32>
    %769 = math.tanh %768 : vector<1x2xf32>
    %cst_271 = arith.constant 1.000000e+00 : f32
    %770 = vector.broadcast %cst_271 : f32 to vector<1x2xf32>
    %771 = arith.addf %769, %770 : vector<1x2xf32>
    %cst_272 = arith.constant 5.000000e-01 : f32
    %772 = vector.broadcast %cst_272 : f32 to vector<1x2xf32>
    %773 = arith.mulf %772, %771 : vector<1x2xf32>
    %c20_273 = arith.constant 20 : index
    %c0_274 = arith.constant 0 : index
    %774 = vector.load %arg6[%c20_273, %c0_274] : memref<32x2xf32, #tpu.memory_space<vmem>>, vector<1x2xf32>
    %775 = vector.broadcast %556 : f32 to vector<1x2xf32>
    %776 = arith.mulf %746, %775 : vector<1x2xf32>
    %777 = arith.addf %774, %776 : vector<1x2xf32>
    %778 = math.tanh %777 : vector<1x2xf32>
    %c28_275 = arith.constant 28 : index
    %c0_276 = arith.constant 0 : index
    %779 = vector.load %arg6[%c28_275, %c0_276] : memref<32x2xf32, #tpu.memory_space<vmem>>, vector<1x2xf32>
    %780 = vector.broadcast %557 : f32 to vector<1x2xf32>
    %781 = arith.mulf %746, %780 : vector<1x2xf32>
    %782 = arith.addf %779, %781 : vector<1x2xf32>
    %cst_277 = arith.constant 5.000000e-01 : f32
    %783 = vector.broadcast %cst_277 : f32 to vector<1x2xf32>
    %784 = arith.mulf %783, %782 : vector<1x2xf32>
    %785 = math.tanh %784 : vector<1x2xf32>
    %cst_278 = arith.constant 1.000000e+00 : f32
    %786 = vector.broadcast %cst_278 : f32 to vector<1x2xf32>
    %787 = arith.addf %785, %786 : vector<1x2xf32>
    %cst_279 = arith.constant 5.000000e-01 : f32
    %788 = vector.broadcast %cst_279 : f32 to vector<1x2xf32>
    %789 = arith.mulf %788, %787 : vector<1x2xf32>
    %790 = arith.mulf %773, %744 : vector<1x2xf32>
    %791 = arith.mulf %762, %778 : vector<1x2xf32>
    %792 = arith.addf %790, %791 : vector<1x2xf32>
    %793 = math.tanh %792 : vector<1x2xf32>
    %794 = arith.mulf %789, %793 : vector<1x2xf32>
    %795 = vector.broadcast %552 : f32 to vector<1x2xf32>
    %796 = arith.mulf %794, %795 : vector<1x2xf32>
    %797 = vector.broadcast %553 : f32 to vector<1x2xf32>
    %798 = arith.addf %796, %797 : vector<1x2xf32>
    %c4_280 = arith.constant 4 : index
    %c0_281 = arith.constant 0 : index
    %799 = vector.load %arg3[%c4_280, %c0_281] : memref<8x2xf32, #tpu.memory_space<vmem>>, vector<1x2xf32>
    tpu.vector_store %arg3[%c4_280, %c0_281], %798 {strides = array<i32>} : memref<8x2xf32, #tpu.memory_space<vmem>>, vector<1x2xf32>,
    %c5_282 = arith.constant 5 : index
    %c0_283 = arith.constant 0 : index
    %800 = vector.load %arg6[%c5_282, %c0_283] : memref<32x2xf32, #tpu.memory_space<vmem>>, vector<1x2xf32>
    %801 = vector.broadcast %554 : f32 to vector<1x2xf32>
    %802 = arith.mulf %794, %801 : vector<1x2xf32>
    %803 = arith.addf %800, %802 : vector<1x2xf32>
    %cst_284 = arith.constant 5.000000e-01 : f32
    %804 = vector.broadcast %cst_284 : f32 to vector<1x2xf32>
    %805 = arith.mulf %804, %803 : vector<1x2xf32>
    %806 = math.tanh %805 : vector<1x2xf32>
    %cst_285 = arith.constant 1.000000e+00 : f32
    %807 = vector.broadcast %cst_285 : f32 to vector<1x2xf32>
    %808 = arith.addf %806, %807 : vector<1x2xf32>
    %cst_286 = arith.constant 5.000000e-01 : f32
    %809 = vector.broadcast %cst_286 : f32 to vector<1x2xf32>
    %810 = arith.mulf %809, %808 : vector<1x2xf32>
    %c13_287 = arith.constant 13 : index
    %c0_288 = arith.constant 0 : index
    %811 = vector.load %arg6[%c13_287, %c0_288] : memref<32x2xf32, #tpu.memory_space<vmem>>, vector<1x2xf32>
    %812 = vector.broadcast %555 : f32 to vector<1x2xf32>
    %813 = arith.mulf %794, %812 : vector<1x2xf32>
    %814 = arith.addf %811, %813 : vector<1x2xf32>
    %cst_289 = arith.constant 5.000000e-01 : f32
    %815 = vector.broadcast %cst_289 : f32 to vector<1x2xf32>
    %816 = arith.mulf %815, %814 : vector<1x2xf32>
    %817 = math.tanh %816 : vector<1x2xf32>
    %cst_290 = arith.constant 1.000000e+00 : f32
    %818 = vector.broadcast %cst_290 : f32 to vector<1x2xf32>
    %819 = arith.addf %817, %818 : vector<1x2xf32>
    %cst_291 = arith.constant 5.000000e-01 : f32
    %820 = vector.broadcast %cst_291 : f32 to vector<1x2xf32>
    %821 = arith.mulf %820, %819 : vector<1x2xf32>
    %c21_292 = arith.constant 21 : index
    %c0_293 = arith.constant 0 : index
    %822 = vector.load %arg6[%c21_292, %c0_293] : memref<32x2xf32, #tpu.memory_space<vmem>>, vector<1x2xf32>
    %823 = vector.broadcast %556 : f32 to vector<1x2xf32>
    %824 = arith.mulf %794, %823 : vector<1x2xf32>
    %825 = arith.addf %822, %824 : vector<1x2xf32>
    %826 = math.tanh %825 : vector<1x2xf32>
    %c29_294 = arith.constant 29 : index
    %c0_295 = arith.constant 0 : index
    %827 = vector.load %arg6[%c29_294, %c0_295] : memref<32x2xf32, #tpu.memory_space<vmem>>, vector<1x2xf32>
    %828 = vector.broadcast %557 : f32 to vector<1x2xf32>
    %829 = arith.mulf %794, %828 : vector<1x2xf32>
    %830 = arith.addf %827, %829 : vector<1x2xf32>
    %cst_296 = arith.constant 5.000000e-01 : f32
    %831 = vector.broadcast %cst_296 : f32 to vector<1x2xf32>
    %832 = arith.mulf %831, %830 : vector<1x2xf32>
    %833 = math.tanh %832 : vector<1x2xf32>
    %cst_297 = arith.constant 1.000000e+00 : f32
    %834 = vector.broadcast %cst_297 : f32 to vector<1x2xf32>
    %835 = arith.addf %833, %834 : vector<1x2xf32>
    %cst_298 = arith.constant 5.000000e-01 : f32
    %836 = vector.broadcast %cst_298 : f32 to vector<1x2xf32>
    %837 = arith.mulf %836, %835 : vector<1x2xf32>
    %838 = arith.mulf %821, %792 : vector<1x2xf32>
    %839 = arith.mulf %810, %826 : vector<1x2xf32>
    %840 = arith.addf %838, %839 : vector<1x2xf32>
    %841 = math.tanh %840 : vector<1x2xf32>
    %842 = arith.mulf %837, %841 : vector<1x2xf32>
    %843 = vector.broadcast %552 : f32 to vector<1x2xf32>
    %844 = arith.mulf %842, %843 : vector<1x2xf32>
    %845 = vector.broadcast %553 : f32 to vector<1x2xf32>
    %846 = arith.addf %844, %845 : vector<1x2xf32>
    %c5_299 = arith.constant 5 : index
    %c0_300 = arith.constant 0 : index
    %847 = vector.load %arg3[%c5_299, %c0_300] : memref<8x2xf32, #tpu.memory_space<vmem>>, vector<1x2xf32>
    tpu.vector_store %arg3[%c5_299, %c0_300], %846 {strides = array<i32>} : memref<8x2xf32, #tpu.memory_space<vmem>>, vector<1x2xf32>,
    %c6_301 = arith.constant 6 : index
    %c0_302 = arith.constant 0 : index
    %848 = vector.load %arg6[%c6_301, %c0_302] : memref<32x2xf32, #tpu.memory_space<vmem>>, vector<1x2xf32>
    %849 = vector.broadcast %554 : f32 to vector<1x2xf32>
    %850 = arith.mulf %842, %849 : vector<1x2xf32>
    %851 = arith.addf %848, %850 : vector<1x2xf32>
    %cst_303 = arith.constant 5.000000e-01 : f32
    %852 = vector.broadcast %cst_303 : f32 to vector<1x2xf32>
    %853 = arith.mulf %852, %851 : vector<1x2xf32>
    %854 = math.tanh %853 : vector<1x2xf32>
    %cst_304 = arith.constant 1.000000e+00 : f32
    %855 = vector.broadcast %cst_304 : f32 to vector<1x2xf32>
    %856 = arith.addf %854, %855 : vector<1x2xf32>
    %cst_305 = arith.constant 5.000000e-01 : f32
    %857 = vector.broadcast %cst_305 : f32 to vector<1x2xf32>
    %858 = arith.mulf %857, %856 : vector<1x2xf32>
    %c14_306 = arith.constant 14 : index
    %c0_307 = arith.constant 0 : index
    %859 = vector.load %arg6[%c14_306, %c0_307] : memref<32x2xf32, #tpu.memory_space<vmem>>, vector<1x2xf32>
    %860 = vector.broadcast %555 : f32 to vector<1x2xf32>
    %861 = arith.mulf %842, %860 : vector<1x2xf32>
    %862 = arith.addf %859, %861 : vector<1x2xf32>
    %cst_308 = arith.constant 5.000000e-01 : f32
    %863 = vector.broadcast %cst_308 : f32 to vector<1x2xf32>
    %864 = arith.mulf %863, %862 : vector<1x2xf32>
    %865 = math.tanh %864 : vector<1x2xf32>
    %cst_309 = arith.constant 1.000000e+00 : f32
    %866 = vector.broadcast %cst_309 : f32 to vector<1x2xf32>
    %867 = arith.addf %865, %866 : vector<1x2xf32>
    %cst_310 = arith.constant 5.000000e-01 : f32
    %868 = vector.broadcast %cst_310 : f32 to vector<1x2xf32>
    %869 = arith.mulf %868, %867 : vector<1x2xf32>
    %c22_311 = arith.constant 22 : index
    %c0_312 = arith.constant 0 : index
    %870 = vector.load %arg6[%c22_311, %c0_312] : memref<32x2xf32, #tpu.memory_space<vmem>>, vector<1x2xf32>
    %871 = vector.broadcast %556 : f32 to vector<1x2xf32>
    %872 = arith.mulf %842, %871 : vector<1x2xf32>
    %873 = arith.addf %870, %872 : vector<1x2xf32>
    %874 = math.tanh %873 : vector<1x2xf32>
    %c30_313 = arith.constant 30 : index
    %c0_314 = arith.constant 0 : index
    %875 = vector.load %arg6[%c30_313, %c0_314] : memref<32x2xf32, #tpu.memory_space<vmem>>, vector<1x2xf32>
    %876 = vector.broadcast %557 : f32 to vector<1x2xf32>
    %877 = arith.mulf %842, %876 : vector<1x2xf32>
    %878 = arith.addf %875, %877 : vector<1x2xf32>
    %cst_315 = arith.constant 5.000000e-01 : f32
    %879 = vector.broadcast %cst_315 : f32 to vector<1x2xf32>
    %880 = arith.mulf %879, %878 : vector<1x2xf32>
    %881 = math.tanh %880 : vector<1x2xf32>
    %cst_316 = arith.constant 1.000000e+00 : f32
    %882 = vector.broadcast %cst_316 : f32 to vector<1x2xf32>
    %883 = arith.addf %881, %882 : vector<1x2xf32>
    %cst_317 = arith.constant 5.000000e-01 : f32
    %884 = vector.broadcast %cst_317 : f32 to vector<1x2xf32>
    %885 = arith.mulf %884, %883 : vector<1x2xf32>
    %886 = arith.mulf %869, %840 : vector<1x2xf32>
    %887 = arith.mulf %858, %874 : vector<1x2xf32>
    %888 = arith.addf %886, %887 : vector<1x2xf32>
    %889 = math.tanh %888 : vector<1x2xf32>
    %890 = arith.mulf %885, %889 : vector<1x2xf32>
    %891 = vector.broadcast %552 : f32 to vector<1x2xf32>
    %892 = arith.mulf %890, %891 : vector<1x2xf32>
    %893 = vector.broadcast %553 : f32 to vector<1x2xf32>
    %894 = arith.addf %892, %893 : vector<1x2xf32>
    %c6_318 = arith.constant 6 : index
    %c0_319 = arith.constant 0 : index
    %895 = vector.load %arg3[%c6_318, %c0_319] : memref<8x2xf32, #tpu.memory_space<vmem>>, vector<1x2xf32>
    tpu.vector_store %arg3[%c6_318, %c0_319], %894 {strides = array<i32>} : memref<8x2xf32, #tpu.memory_space<vmem>>, vector<1x2xf32>,
    %c7_320 = arith.constant 7 : index
    %c0_321 = arith.constant 0 : index
    %896 = vector.load %arg6[%c7_320, %c0_321] : memref<32x2xf32, #tpu.memory_space<vmem>>, vector<1x2xf32>
    %897 = vector.broadcast %554 : f32 to vector<1x2xf32>
    %898 = arith.mulf %890, %897 : vector<1x2xf32>
    %899 = arith.addf %896, %898 : vector<1x2xf32>
    %cst_322 = arith.constant 5.000000e-01 : f32
    %900 = vector.broadcast %cst_322 : f32 to vector<1x2xf32>
    %901 = arith.mulf %900, %899 : vector<1x2xf32>
    %902 = math.tanh %901 : vector<1x2xf32>
    %cst_323 = arith.constant 1.000000e+00 : f32
    %903 = vector.broadcast %cst_323 : f32 to vector<1x2xf32>
    %904 = arith.addf %902, %903 : vector<1x2xf32>
    %cst_324 = arith.constant 5.000000e-01 : f32
    %905 = vector.broadcast %cst_324 : f32 to vector<1x2xf32>
    %906 = arith.mulf %905, %904 : vector<1x2xf32>
    %c15_325 = arith.constant 15 : index
    %c0_326 = arith.constant 0 : index
    %907 = vector.load %arg6[%c15_325, %c0_326] : memref<32x2xf32, #tpu.memory_space<vmem>>, vector<1x2xf32>
    %908 = vector.broadcast %555 : f32 to vector<1x2xf32>
    %909 = arith.mulf %890, %908 : vector<1x2xf32>
    %910 = arith.addf %907, %909 : vector<1x2xf32>
    %cst_327 = arith.constant 5.000000e-01 : f32
    %911 = vector.broadcast %cst_327 : f32 to vector<1x2xf32>
    %912 = arith.mulf %911, %910 : vector<1x2xf32>
    %913 = math.tanh %912 : vector<1x2xf32>
    %cst_328 = arith.constant 1.000000e+00 : f32
    %914 = vector.broadcast %cst_328 : f32 to vector<1x2xf32>
    %915 = arith.addf %913, %914 : vector<1x2xf32>
    %cst_329 = arith.constant 5.000000e-01 : f32
    %916 = vector.broadcast %cst_329 : f32 to vector<1x2xf32>
    %917 = arith.mulf %916, %915 : vector<1x2xf32>
    %c23_330 = arith.constant 23 : index
    %c0_331 = arith.constant 0 : index
    %918 = vector.load %arg6[%c23_330, %c0_331] : memref<32x2xf32, #tpu.memory_space<vmem>>, vector<1x2xf32>
    %919 = vector.broadcast %556 : f32 to vector<1x2xf32>
    %920 = arith.mulf %890, %919 : vector<1x2xf32>
    %921 = arith.addf %918, %920 : vector<1x2xf32>
    %922 = math.tanh %921 : vector<1x2xf32>
    %c31_332 = arith.constant 31 : index
    %c0_333 = arith.constant 0 : index
    %923 = vector.load %arg6[%c31_332, %c0_333] : memref<32x2xf32, #tpu.memory_space<vmem>>, vector<1x2xf32>
    %924 = vector.broadcast %557 : f32 to vector<1x2xf32>
    %925 = arith.mulf %890, %924 : vector<1x2xf32>
    %926 = arith.addf %923, %925 : vector<1x2xf32>
    %cst_334 = arith.constant 5.000000e-01 : f32
    %927 = vector.broadcast %cst_334 : f32 to vector<1x2xf32>
    %928 = arith.mulf %927, %926 : vector<1x2xf32>
    %929 = math.tanh %928 : vector<1x2xf32>
    %cst_335 = arith.constant 1.000000e+00 : f32
    %930 = vector.broadcast %cst_335 : f32 to vector<1x2xf32>
    %931 = arith.addf %929, %930 : vector<1x2xf32>
    %cst_336 = arith.constant 5.000000e-01 : f32
    %932 = vector.broadcast %cst_336 : f32 to vector<1x2xf32>
    %933 = arith.mulf %932, %931 : vector<1x2xf32>
    %934 = arith.mulf %917, %888 : vector<1x2xf32>
    %935 = arith.mulf %906, %922 : vector<1x2xf32>
    %936 = arith.addf %934, %935 : vector<1x2xf32>
    %937 = math.tanh %936 : vector<1x2xf32>
    %938 = arith.mulf %933, %937 : vector<1x2xf32>
    %939 = vector.broadcast %552 : f32 to vector<1x2xf32>
    %940 = arith.mulf %938, %939 : vector<1x2xf32>
    %941 = vector.broadcast %553 : f32 to vector<1x2xf32>
    %942 = arith.addf %940, %941 : vector<1x2xf32>
    %c7_337 = arith.constant 7 : index
    %c0_338 = arith.constant 0 : index
    %943 = vector.load %arg3[%c7_337, %c0_338] : memref<8x2xf32, #tpu.memory_space<vmem>>, vector<1x2xf32>
    tpu.vector_store %arg3[%c7_337, %c0_338], %942 {strides = array<i32>} : memref<8x2xf32, #tpu.memory_space<vmem>>, vector<1x2xf32>,
    return
  }
}

</mosaic_0001>

<bundles_post_ra>
// kernel: tpu_custom_call.1
= control target key start
LH: loop header
LB: loop body
LE: loop exit
PB: predicated region body
PF: predicated region fallthrough
CT: control target
= control target key end

     0   :  { %8 = vsyncpa [#allocation6], 0  ;;  %s1362_s0 = inlined_call_operand.vmem [shape: f32[8,2], index: 0, kind: input, shape index: {}]   ;;  %s1363_s1 = inlined_call_operand.vmem [shape: f32[4,8,2], index: 1, kind: input, shape index: {}]   ;;  %s1364_s2 = inlined_call_operand.vmem [shape: f32[58], index: 2, kind: input, shape index: {}]   ;;  %s1365_s3 = inlined_call_operand.vmem [shape: f32[8,2], index: 3, kind: output, shape index: {}]  }
   0x1   :  { %s19_s14 = sshll.u32 %s1364_s2, 4  ;;  %s20_s14 = int_to_ptr.vmem [resolvable:$true] %s19_s14 }
   0x2   :  { %s980_s15 = scalar_lea.vmem %s20_s14, 16  ;;  %p985_p1 = scmp.lt.s32.totalorder %s20_s14, %s20_s14 }
   0x3   :  { %p981_p0 = scmp.ne.s32.totalorder %s20_s14, %s980_s15  ;;  %p986_p2 = scmp.lt.s32.totalorder %s980_s15, %s980_s15 }
   0x5   :  { %p987_p3 = por %p986_p2, %p985_p1 }
   0x7   :  { %p988_p4 = pnand %p987_p3, %p981_p0 }
   0x9   :  { %991 = shalt.err (!%p988_p4)
}
   0xa   :  { %s994_s16 = smov [#allocation5]  }
   0xb   :  { %22 = dma.vmem_to_smem %s20_s14, 16, %s994_s16, [#allocation6]  }
   0xc   :  { %992 = dma.done.wait [#allocation6], 16  }
   0xd   :  { %993 = vsyncadd [#allocation6], 4294967280 }
   0xe   :  { %26 = sfence }
   0xf   :  { %s35_s17 = sld [smem:[#allocation5]]  ;;  %s764_s20 = sld [smem:[#allocation5 + $0xc]]  ;;  %v1025_v0 = vld [vmem:[%s1362_s0] sm:$0xff]  ;;  %v1043_v2 = vld [vmem:[%s1363_s1 + $0x8] sm:$0xff]  ;;  %v1057_v7 = vld [vmem:[%s1363_s1 + $0x10] sm:$0xff]  ;;  %vm57_vm0 = vcmask 15360  }
  0x10   :  { %s762_s18 = sld [smem:[#allocation5 + $0x18]]  ;;  %s1020_s2 = sld [smem:[#allocation5 + $0x14]]  ;;  %v1034_v1 = vld [vmem:[%s1363_s1] sm:$0xff]  ;;  %v1068_v11 = vld [vmem:[%s1363_s1 + $0x18] sm:$0xff]  ;;  %vm166_vm1 = vcmask 8192  }
  0x11   :  { %s763_s19 = sld [smem:[#allocation5 + $0x8]]  ;;  %s1027_s24 = sld [smem:[#allocation5 + $0x1]] }
  0x12   :  { %s1018_s21 = sld [smem:[#allocation5 + $0x10]]  ;;  %s1029_s25 = sld [smem:[#allocation5 + $0x19]] }
  0x13   :  { %s1036_s28 = sld [smem:[#allocation5 + $0x9]]  ;;  %s1038_s29 = sld [smem:[#allocation5 + $0xd]] }
  0x14   :  { %s1045_s0 = sld [smem:[#allocation5 + $0x11]]  ;;  %s1047_s5 = sld [smem:[#allocation5 + $0x15]] }
  0x15   :  { %v36_v3 = vstv %s35_s17  ;;  %s1050_s6 = sld [smem:[#allocation5 + $0x2]]  ;;  %v46_v9 = vstv %s764_s20  ;;  %s1063_s11 = sld [smem:[#allocation5 + $0xe]] }
  0x16   :  { %v37_v4 = vmul.f32 %v36_v3, %v1025_v0  ;;  %v39_v5 = vstv %s762_s18  ;;  %s1052_s7 = sld [smem:[#allocation5 + $0x1a]]  ;;  %v47_v13 = vmul.f32 %v1043_v2, %v46_v9  ;;  %v54_v14 = vstv %s1020_s2  ;;  %s1074_s15 = sld [smem:[#allocation5 + $0x16]] }
  0x17   :  { %v42_v6 = vstv %s763_s19  ;;  %s1061_s10 = sld [smem:[#allocation5 + $0xa]]  ;;  %s1076_s16 = sld [smem:[#allocation5 + $0x4]]  ;;  %v60_v15 = vstv %s1027_s24  ;;  %v55_v21 = vmul.f32 %v1068_v11, %v54_v14 }
  0x18   :  { %v43_v8 = vmul.f32 %v42_v6, %v1034_v1  ;;  %v50_v10 = vstv %s1018_s21  ;;  %v40_v12 = vadd.f32 %v39_v5, %v37_v4  ;;  %s1072_s14 = sld [smem:[#allocation5 + $0x12]]  ;;  %v63_v16 = vstv %s1029_s25  ;;  %s1080_s17 = sld [smem:[#allocation5 + $0x3]] }
  0x19   :  { %v51_v18 = vmul.f32 %v1057_v7, %v50_v10  ;;  %v61_v19 = vmul.f32 %v60_v15, %v1025_v0  ;;  %v66_v20 = vstv %s1036_s28  ;;  %s1085_s1 = sld [smem:[#allocation5 + $0x1b]]  ;;  %v70_v23 = vstv %s1038_s29  ;;  %s1093_s19 = sld [smem:[#allocation5 + $0xf]] }
  0x1a   :  { %v44_v17 = vadd.f32 %v43_v8, %v40_v12  ;;  %s1087_s18 = sld [smem:[#allocation5 + $0xb]]  ;;  %v67_v22 = vmul.f32 %v66_v20, %v1034_v1  ;;  %v74_v24 = vstv %s1045_s0  ;;  %v71_v27 = vmul.f32 %v1043_v2, %v70_v23  ;;  %s1103_s21 = sld [smem:[#allocation5 + $0x17]] }
  0x1b   :  { %s1095_s20 = sld [smem:[#allocation5 + $0x13]]  ;;  %v64_v26 = vadd.f32 %v63_v16, %v61_v19  ;;  %v78_v28 = vstv %s1047_s5  ;;  %v75_v29 = vmul.f32 %v1057_v7, %v74_v24  ;;  %v83_v30 = vstv %s1050_s6  ;;  %s786_s2 = sld [smem:[#allocation5 + $0x5]] }
  0x1c   :  { %v48_v25 = vadd.f32 %v47_v13, %v44_v17  ;;  %v86_v31 = vstv %s1052_s7  ;;  %v84_v35 = vmul.f32 %v83_v30, %v1025_v0  ;;  %v79_v37 = vmul.f32 %v1068_v11, %v78_v28  ;;  %s787_s22 = sld [smem:[#allocation5 + $0x6]]  ;;  %s788_s23 = sld [smem:[#allocation5 + $0x7]] }
  0x1d   :  { %v89_v32 = vstv %s1061_s10  ;;  %v68_v34 = vadd.f32 %v67_v22, %v64_v26  ;;  %v93_v38 = vstv %s1063_s11  ;;  %v101_v40 = vstv %s1074_s15  ;;  %s1177_s24 = sld [smem:[#allocation5 + $0x1c]]  ;;  %s1179_s25 = sld [smem:[#allocation5 + $0x1d]] }
  0x1e   :  { %v52_v33 = vadd.f32 %v51_v18, %v48_v25  ;;  %v90_v36 = vmul.f32 %v89_v32, %v1034_v1  ;;  %v97_v39 = vstv %s1072_s14  ;;  %v87_v43 = vadd.f32 %v86_v31, %v84_v35  ;;  %s1181_s26 = sld [smem:[#allocation5 + $0x1e]]  ;;  %s1183_s27 = sld [smem:[#allocation5 + $0x1f]] }
  0x1f   :  { %v72_v42 = vadd.f32 %v71_v27, %v68_v34  ;;  %v94_v44 = vmul.f32 %v1043_v2, %v93_v38  ;;  %v1113_v45 = vstv %s1076_s16  ;;  %v98_v46 = vmul.f32 %v1057_v7, %v97_v39  ;;  %s1185_s28 = sld [smem:[#allocation5 + $0x34]]  ;;  %s1189_s30 = sld [smem:[#allocation5 + $0x35]] }
  0x20   :  { %v56_v41 = vadd.f32 %v55_v21, %v52_v33  ;;  %v106_v47 = vstv %s1080_s17  ;;  %v91_v49 = vadd.f32 %v90_v36, %v87_v43  ;;  %v109_v51 = vstv %s1085_s1  ;;  %s1187_s29 = sld [smem:[#allocation5 + $0x24]]  ;;  %s1191_s4 = sld [smem:[#allocation5 + $0x25]] }
  0x21   :  { %v76_v48 = vadd.f32 %v75_v29, %v72_v42  ;;  %v107_v50 = vmul.f32 %v106_v47, %v1025_v0  ;;  %v102_v52 = vmul.f32 %v1068_v11, %v101_v40  ;;  %v112_v53 = vstv %s1087_s18  ;;  %s1193_s0 = sld [smem:[#allocation5 + $0x28]]  ;;  %s1195_s5 = sld [smem:[#allocation5 + $0x29]] }
  0x22   :  { %58 = vst.msk [vmem:[#allocation2] sm:$0xff] %vm57_vm0, %v56_v41  ;;  %v116_v54 = vstv %s1093_s19  ;;  %v120_v55 = vstv %s1095_s20  ;;  %v95_v57 = vadd.f32 %v94_v44, %v91_v49  ;;  %v113_v59 = vmul.f32 %v112_v53, %v1034_v1  ;;  %s1197_s6 = sld [smem:[#allocation5 + $0x36]]  ;;  %s1201_s8 = sld [smem:[#allocation5 + $0x2c]] }
  0x23   :  { %v80_v56 = vadd.f32 %v79_v37, %v76_v48  ;;  %v110_v58 = vadd.f32 %v109_v51, %v107_v50  ;;  %v117_v60 = vmul.f32 %v1043_v2, %v116_v54  ;;  %v124_v61 = vstv %s1103_s21  ;;  %s1199_s7 = sld [smem:[#allocation5 + $0x26]]  ;;  %s1203_s9 = sld [smem:[#allocation5 + $0x2d]] }
  0x24   :  { %v134_v62 = vmul.f32 0.0, %v1113_v45  ;;  %v99_v63 = vadd.f32 %v98_v46, %v95_v57  ;;  %v121_v3 = vmul.f32 %v1057_v7, %v120_v55  ;;  %v1130_v4 = vstv %s786_s2  ;;  %s1205_s10 = sld [smem:[#allocation5 + $0x2a]]  ;;  %s1207_s11 = sld [smem:[#allocation5 + $0x27]] }
  0x25   :  { %81 = vst.msk [vmem:[#allocation2 + $0x8] sm:$0xff] %vm57_vm0, %v80_v56  ;;  %v114_v0 = vadd.f32 %v113_v59, %v110_v58  ;;  %v125_v8 = vmul.f32 %v1068_v11, %v124_v61  ;;  %v142_v13 = vmul.f32 0.0, %v1130_v4  ;;  %v1135_v14 = vstv %s787_s22  ;;  %s1209_s12 = sld [smem:[#allocation5 + $0x30]]  ;;  %s1211_s13 = sld [smem:[#allocation5 + $0x31]] }
  0x26   :  { %v103_v5 = vadd.f32 %v102_v52, %v99_v63  ;;  %v150_v18 = vmul.f32 0.0, %v1135_v14  ;;  %v1139_v20 = vstv %s788_s23  ;;  %s1213_s14 = sld [smem:[#allocation5 + $0x2e]]  ;;  %s1215_s15 = sld [smem:[#allocation5 + $0x2b]] }
  0x27   :  { %v118_v6 = vadd.f32 %v117_v60, %v114_v0  ;;  %v155_v24 = vmul.f32 0.0, %v1139_v20  ;;  %s1217_s16 = sld [smem:[#allocation5 + $0x37]]  ;;  %s1226_s1 = sld [smem:[#allocation5 + $0x32]] }
  0x28   :  { %104 = vst.msk [vmem:[#allocation2 + $0x10] sm:$0xff] %vm57_vm0, %v103_v5  ;;  %s1219_s17 = sld [smem:[#allocation5 + $0x2f]]  ;;  %s1228_s18 = sld [smem:[#allocation5 + $0x33]] }
  0x29   :  { %v132_v9 = vld [vmem:[#allocation2] sm:$0x1]  ;;  %v122_v12 = vadd.f32 %v121_v3, %v118_v6  ;;  %v168_v46 = vld [vmem:[#allocation2 + $0x1] sm:$0x1]  ;;  %s815_s19 = sld [smem:[#allocation5 + $0x20]]  ;;  %s816_s20 = sld [smem:[#allocation5 + $0x21]] }
  0x2a   :  { %v135_v10 = vadd.f32 %v134_v62, %v132_v9  ;;  %s817_s21 = sld [smem:[#allocation5 + $0x22]]  ;;  %s818_s2 = sld [smem:[#allocation5 + $0x23]] }
  0x2b   :  { %v126_v15 = vadd.f32 %v125_v8, %v122_v12  ;;  %s813_s22 = sld [smem:[#allocation5 + $0x38]]  ;;  %s814_s23 = sld [smem:[#allocation5 + $0x39]] }
  0x2c   :  { %v136_v16 = vmul.f32 0.5, %v135_v10  ;;  %v140_v17 = vld [vmem:[#allocation2 + $0x8] sm:$0x1]  ;;  %v175_v47 = vld [vmem:[#allocation2 + $0x9] sm:$0x1] }
  0x2d   :  { %127 = vst.msk [vmem:[#allocation2 + $0x18] sm:$0xff] %vm57_vm0, %v126_v15  ;;  %v143_v19 = vadd.f32 %v142_v13, %v140_v17 }
  0x2e   :  { %820 = vtanh.f32 %v136_v16 }
  0x2f   :  { %v144_v21 = vmul.f32 0.5, %v143_v19  ;;  %v148_v22 = vld [vmem:[#allocation2 + $0x10] sm:$0x1]  ;;  %v182_v53 = vld [vmem:[#allocation2 + $0x11] sm:$0x1] }
  0x30   :  { %v151_v23 = vadd.f32 %v150_v18, %v148_v22  ;;  %v199_v18 = vld [vmem:[#allocation2 + $0x2] sm:$0x1]  ;;  %v206_v19 = vld [vmem:[#allocation2 + $0xa] sm:$0x1] }
  0x31   :  { %822 = vtanh.f32 %v144_v21 }
  0x32   :  { %824 = vtanh.f32 %v151_v23 }
  0x34   :  { %v153_v25 = vld [vmem:[#allocation2 + $0x18] sm:$0x1]  ;;  %v186_v56 = vld [vmem:[#allocation2 + $0x19] sm:$0x1] }
  0x35   :  { %v156_v26 = vadd.f32 %v155_v24, %v153_v25 }
  0x37   :  { %v157_v28 = vmul.f32 0.5, %v156_v26  ;;  %v213_v26 = vld [vmem:[#allocation2 + $0x12] sm:$0x1] }
  0x38   :  { %v821_v27 = vpop.eup %820 }
  0x39   :  { %v138_v29 = vadd.f32 1.0, %v821_v27  ;;  %826 = vtanh.f32 %v157_v28 }
  0x3b   :  { %v139_v30 = vmul.f32 0.5, %v138_v29  ;;  %v823_v31 = vpop.eup %822  ;;  %v217_v29 = vld [vmem:[#allocation2 + $0x1a] sm:$0x1] }
  0x3c   :  { %v146_v32 = vadd.f32 1.0, %v823_v31  ;;  %v825_v33 = vpop.eup %824 }
  0x3d   :  { %v162_v35 = vmul.f32 %v825_v33, %v139_v30 }
  0x3e   :  { %v147_v34 = vmul.f32 0.5, %v146_v32 }
  0x40   :  { %v161_v36 = vmul.f32 0.0, %v147_v34 }
  0x42   :  { %v163_v37 = vadd.f32 %v162_v35, %v161_v36 }
  0x43   :  { %v827_v38 = vpop.eup %826 }
  0x44   :  { %828 = vtanh.f32 %v163_v37  ;;  %v159_v39 = vadd.f32 1.0, %v827_v38 }
  0x46   :  { %v160_v40 = vmul.f32 0.5, %v159_v39 }
  0x4e   :  { %v829_v41 = vpop.eup %828 }
  0x4f   :  { %v165_v42 = vmul.f32 %v829_v41, %v160_v40 }
  0x51   :  { %167 = vst.msk [vmem:[#allocation3] sm:$0x1] %vm166_vm1, %v165_v42  ;;  %v169_v43 = vmul.f32 %v165_v42, %v1113_v45  ;;  %v176_v44 = vmul.f32 %v165_v42, %v1130_v4  ;;  %v183_v50 = vmul.f32 %v165_v42, %v1135_v14  ;;  %v187_v55 = vmul.f32 %v165_v42, %v1139_v20 }
  0x53   :  { %v170_v48 = vadd.f32 %v169_v43, %v168_v46  ;;  %v177_v49 = vadd.f32 %v176_v44, %v175_v47  ;;  %v184_v54 = vadd.f32 %v183_v50, %v182_v53  ;;  %v188_v57 = vadd.f32 %v187_v55, %v186_v56  ;;  %v230_v50 = vld [vmem:[#allocation2 + $0x3] sm:$0x1] }
  0x55   :  { %v171_v51 = vmul.f32 0.5, %v170_v48  ;;  %v178_v52 = vmul.f32 0.5, %v177_v49  ;;  %v189_v58 = vmul.f32 0.5, %v188_v57  ;;  %v244_v57 = vld [vmem:[#allocation2 + $0x13] sm:$0x1] }
  0x57   :  { %830 = vtanh.f32 %v171_v51  ;;  %v237_v51 = vld [vmem:[#allocation2 + $0xb] sm:$0x1] }
  0x58   :  { %832 = vtanh.f32 %v178_v52 }
  0x59   :  { %834 = vtanh.f32 %v184_v54 }
  0x5a   :  { %836 = vtanh.f32 %v189_v58 }
  0x61   :  { %v831_v59 = vpop.eup %830 }
  0x62   :  { %v833_v60 = vpop.eup %832  ;;  %v173_v61 = vadd.f32 1.0, %v831_v59 }
  0x63   :  { %v180_v62 = vadd.f32 1.0, %v833_v60  ;;  %v835_v0 = vpop.eup %834  ;;  %v248_v60 = vld [vmem:[#allocation2 + $0x1b] sm:$0x1] }
  0x64   :  { %v174_v63 = vmul.f32 0.5, %v173_v61  ;;  %v837_v9 = vpop.eup %836 }
  0x65   :  { %v181_v3 = vmul.f32 0.5, %v180_v62  ;;  %v191_v10 = vadd.f32 1.0, %v837_v9 }
  0x66   :  { %v194_v5 = vmul.f32 %v835_v0, %v174_v63 }
  0x67   :  { %v193_v6 = vmul.f32 %v181_v3, %v163_v37  ;;  %v192_v12 = vmul.f32 0.5, %v191_v10 }
  0x69   :  { %v195_v8 = vadd.f32 %v194_v5, %v193_v6 }
  0x6b   :  { %838 = vtanh.f32 %v195_v8 }
  0x75   :  { %v839_v13 = vpop.eup %838 }
  0x76   :  { %v197_v15 = vmul.f32 %v839_v13, %v192_v12 }
  0x78   :  { %198 = vst.msk [vmem:[#allocation3 + $0x1] sm:$0x1] %vm166_vm1, %v197_v15  ;;  %v200_v16 = vmul.f32 %v197_v15, %v1113_v45  ;;  %v207_v17 = vmul.f32 %v197_v15, %v1130_v4  ;;  %v214_v23 = vmul.f32 %v197_v15, %v1135_v14  ;;  %v218_v28 = vmul.f32 %v197_v15, %v1139_v20 }
  0x7a   :  { %v201_v21 = vadd.f32 %v200_v16, %v199_v18  ;;  %v208_v22 = vadd.f32 %v207_v17, %v206_v19  ;;  %v215_v27 = vadd.f32 %v214_v23, %v213_v26  ;;  %v219_v30 = vadd.f32 %v218_v28, %v217_v29  ;;  %v261_v23 = vld [vmem:[#allocation2 + $0x4] sm:$0x1] }
  0x7c   :  { %v202_v24 = vmul.f32 0.5, %v201_v21  ;;  %v209_v25 = vmul.f32 0.5, %v208_v22  ;;  %v220_v31 = vmul.f32 0.5, %v219_v30  ;;  %v275_v30 = vld [vmem:[#allocation2 + $0x14] sm:$0x1] }
  0x7e   :  { %840 = vtanh.f32 %v202_v24  ;;  %v268_v24 = vld [vmem:[#allocation2 + $0xc] sm:$0x1] }
  0x7f   :  { %842 = vtanh.f32 %v209_v25 }
  0x80   :  { %844 = vtanh.f32 %v215_v27 }
  0x81   :  { %846 = vtanh.f32 %v220_v31 }
  0x88   :  { %v841_v32 = vpop.eup %840 }
  0x89   :  { %v843_v33 = vpop.eup %842  ;;  %v204_v34 = vadd.f32 1.0, %v841_v32 }
  0x8a   :  { %v211_v35 = vadd.f32 1.0, %v843_v33  ;;  %v845_v37 = vpop.eup %844  ;;  %v279_v33 = vld [vmem:[#allocation2 + $0x1c] sm:$0x1] }
  0x8b   :  { %v205_v36 = vmul.f32 0.5, %v204_v34  ;;  %v847_v42 = vpop.eup %846 }
  0x8c   :  { %v212_v38 = vmul.f32 0.5, %v211_v35  ;;  %v222_v43 = vadd.f32 1.0, %v847_v42 }
  0x8d   :  { %v225_v39 = vmul.f32 %v845_v37, %v205_v36 }
  0x8e   :  { %v224_v40 = vmul.f32 %v212_v38, %v195_v8  ;;  %v223_v44 = vmul.f32 0.5, %v222_v43 }
  0x90   :  { %v226_v41 = vadd.f32 %v225_v39, %v224_v40 }
  0x92   :  { %848 = vtanh.f32 %v226_v41 }
  0x9c   :  { %v849_v46 = vpop.eup %848 }
  0x9d   :  { %v228_v47 = vmul.f32 %v849_v46, %v223_v44 }
  0x9f   :  { %229 = vst.msk [vmem:[#allocation3 + $0x2] sm:$0x1] %vm166_vm1, %v228_v47  ;;  %v231_v48 = vmul.f32 %v228_v47, %v1113_v45  ;;  %v238_v49 = vmul.f32 %v228_v47, %v1130_v4  ;;  %v245_v54 = vmul.f32 %v228_v47, %v1135_v14  ;;  %v249_v59 = vmul.f32 %v228_v47, %v1139_v20 }
  0xa1   :  { %v232_v52 = vadd.f32 %v231_v48, %v230_v50  ;;  %v239_v53 = vadd.f32 %v238_v49, %v237_v51  ;;  %v246_v58 = vadd.f32 %v245_v54, %v244_v57  ;;  %v250_v61 = vadd.f32 %v249_v59, %v248_v60  ;;  %v292_v54 = vld [vmem:[#allocation2 + $0x5] sm:$0x1] }
  0xa3   :  { %v233_v55 = vmul.f32 0.5, %v232_v52  ;;  %v240_v56 = vmul.f32 0.5, %v239_v53  ;;  %v251_v62 = vmul.f32 0.5, %v250_v61  ;;  %v306_v61 = vld [vmem:[#allocation2 + $0x15] sm:$0x1] }
  0xa5   :  { %850 = vtanh.f32 %v233_v55  ;;  %v299_v55 = vld [vmem:[#allocation2 + $0xd] sm:$0x1] }
  0xa6   :  { %852 = vtanh.f32 %v240_v56 }
  0xa7   :  { %854 = vtanh.f32 %v246_v58 }
  0xa8   :  { %856 = vtanh.f32 %v251_v62 }
  0xaf   :  { %v851_v63 = vpop.eup %850 }
  0xb0   :  { %v853_v0 = vpop.eup %852  ;;  %v235_v3 = vadd.f32 1.0, %v851_v63 }
  0xb1   :  { %v242_v5 = vadd.f32 1.0, %v853_v0  ;;  %v855_v8 = vpop.eup %854  ;;  %v310_v0 = vld [vmem:[#allocation2 + $0x1d] sm:$0x1] }
  0xb2   :  { %v236_v6 = vmul.f32 0.5, %v235_v3  ;;  %v857_v15 = vpop.eup %856 }
  0xb3   :  { %v243_v9 = vmul.f32 0.5, %v242_v5  ;;  %v253_v16 = vadd.f32 1.0, %v857_v15 }
  0xb4   :  { %v256_v10 = vmul.f32 %v855_v8, %v236_v6 }
  0xb5   :  { %v255_v12 = vmul.f32 %v243_v9, %v226_v41  ;;  %v254_v17 = vmul.f32 0.5, %v253_v16 }
  0xb7   :  { %v257_v13 = vadd.f32 %v256_v10, %v255_v12 }
  0xb9   :  { %858 = vtanh.f32 %v257_v13 }
  0xc3   :  { %v859_v18 = vpop.eup %858 }
  0xc4   :  { %v259_v19 = vmul.f32 %v859_v18, %v254_v17 }
  0xc6   :  { %260 = vst.msk [vmem:[#allocation3 + $0x3] sm:$0x1] %vm166_vm1, %v259_v19  ;;  %v262_v21 = vmul.f32 %v259_v19, %v1113_v45  ;;  %v269_v22 = vmul.f32 %v259_v19, %v1130_v4  ;;  %v276_v27 = vmul.f32 %v259_v19, %v1135_v14  ;;  %v280_v32 = vmul.f32 %v259_v19, %v1139_v20 }
  0xc8   :  { %v263_v25 = vadd.f32 %v262_v21, %v261_v23  ;;  %v270_v26 = vadd.f32 %v269_v22, %v268_v24  ;;  %v277_v31 = vadd.f32 %v276_v27, %v275_v30  ;;  %v281_v34 = vadd.f32 %v280_v32, %v279_v33  ;;  %v323_v27 = vld [vmem:[#allocation2 + $0x6] sm:$0x1] }
  0xca   :  { %v264_v28 = vmul.f32 0.5, %v263_v25  ;;  %v271_v29 = vmul.f32 0.5, %v270_v26  ;;  %v282_v35 = vmul.f32 0.5, %v281_v34  ;;  %v337_v34 = vld [vmem:[#allocation2 + $0x16] sm:$0x1] }
  0xcc   :  { %860 = vtanh.f32 %v264_v28  ;;  %v330_v28 = vld [vmem:[#allocation2 + $0xe] sm:$0x1] }
  0xcd   :  { %862 = vtanh.f32 %v271_v29 }
  0xce   :  { %864 = vtanh.f32 %v277_v31 }
  0xcf   :  { %866 = vtanh.f32 %v282_v35 }
  0xd6   :  { %v861_v36 = vpop.eup %860 }
  0xd7   :  { %v863_v37 = vpop.eup %862  ;;  %v266_v38 = vadd.f32 1.0, %v861_v36 }
  0xd8   :  { %v273_v39 = vadd.f32 1.0, %v863_v37  ;;  %v865_v41 = vpop.eup %864  ;;  %v341_v37 = vld [vmem:[#allocation2 + $0x1e] sm:$0x1] }
  0xd9   :  { %v267_v40 = vmul.f32 0.5, %v266_v38  ;;  %v867_v47 = vpop.eup %866 }
  0xda   :  { %v274_v42 = vmul.f32 0.5, %v273_v39  ;;  %v284_v48 = vadd.f32 1.0, %v867_v47 }
  0xdb   :  { %v287_v43 = vmul.f32 %v865_v41, %v267_v40 }
  0xdc   :  { %v286_v44 = vmul.f32 %v274_v42, %v257_v13  ;;  %v285_v49 = vmul.f32 0.5, %v284_v48 }
  0xde   :  { %v288_v46 = vadd.f32 %v287_v43, %v286_v44 }
  0xe0   :  { %868 = vtanh.f32 %v288_v46 }
  0xea   :  { %v869_v50 = vpop.eup %868 }
  0xeb   :  { %v290_v51 = vmul.f32 %v869_v50, %v285_v49 }
  0xed   :  { %291 = vst.msk [vmem:[#allocation3 + $0x4] sm:$0x1] %vm166_vm1, %v290_v51  ;;  %v293_v52 = vmul.f32 %v290_v51, %v1113_v45  ;;  %v300_v53 = vmul.f32 %v290_v51, %v1130_v4  ;;  %v307_v58 = vmul.f32 %v290_v51, %v1135_v14  ;;  %v311_v63 = vmul.f32 %v290_v51, %v1139_v20 }
  0xef   :  { %v294_v56 = vadd.f32 %v293_v52, %v292_v54  ;;  %v301_v57 = vadd.f32 %v300_v53, %v299_v55  ;;  %v308_v62 = vadd.f32 %v307_v58, %v306_v61  ;;  %v312_v3 = vadd.f32 %v311_v63, %v310_v0  ;;  %v354_v58 = vld [vmem:[#allocation2 + $0x7] sm:$0x1] }
  0xf1   :  { %v295_v59 = vmul.f32 0.5, %v294_v56  ;;  %v302_v60 = vmul.f32 0.5, %v301_v57  ;;  %v313_v5 = vmul.f32 0.5, %v312_v3  ;;  %v368_v3 = vld [vmem:[#allocation2 + $0x17] sm:$0x1] }
  0xf3   :  { %870 = vtanh.f32 %v295_v59  ;;  %v361_v59 = vld [vmem:[#allocation2 + $0xf] sm:$0x1] }
  0xf4   :  { %872 = vtanh.f32 %v302_v60 }
  0xf5   :  { %874 = vtanh.f32 %v308_v62 }
  0xf6   :  { %876 = vtanh.f32 %v313_v5 }
  0xfd   :  { %v871_v6 = vpop.eup %870 }
  0xfe   :  { %v873_v8 = vpop.eup %872  ;;  %v297_v9 = vadd.f32 1.0, %v871_v6 }
  0xff   :  { %v304_v10 = vadd.f32 1.0, %v873_v8  ;;  %v875_v13 = vpop.eup %874  ;;  %v372_v8 = vld [vmem:[#allocation2 + $0x1f] sm:$0x1] }
 0x100   :  { %v298_v12 = vmul.f32 0.5, %v297_v9  ;;  %v877_v19 = vpop.eup %876 }
 0x101   :  { %v305_v15 = vmul.f32 0.5, %v304_v10  ;;  %v315_v21 = vadd.f32 1.0, %v877_v19 }
 0x102   :  { %v318_v16 = vmul.f32 %v875_v13, %v298_v12 }
 0x103   :  { %v317_v17 = vmul.f32 %v305_v15, %v288_v46  ;;  %v316_v22 = vmul.f32 0.5, %v315_v21 }
 0x105   :  { %v319_v18 = vadd.f32 %v318_v16, %v317_v17 }
 0x107   :  { %878 = vtanh.f32 %v319_v18 }
 0x111   :  { %v879_v23 = vpop.eup %878 }
 0x112   :  { %v321_v24 = vmul.f32 %v879_v23, %v316_v22 }
 0x114   :  { %322 = vst.msk [vmem:[#allocation3 + $0x5] sm:$0x1] %vm166_vm1, %v321_v24  ;;  %v324_v25 = vmul.f32 %v321_v24, %v1113_v45  ;;  %v331_v26 = vmul.f32 %v321_v24, %v1130_v4  ;;  %v338_v31 = vmul.f32 %v321_v24, %v1135_v14  ;;  %v342_v36 = vmul.f32 %v321_v24, %v1139_v20 }
 0x116   :  { %v325_v29 = vadd.f32 %v324_v25, %v323_v27  ;;  %v332_v30 = vadd.f32 %v331_v26, %v330_v28  ;;  %v339_v35 = vadd.f32 %v338_v31, %v337_v34  ;;  %v343_v38 = vadd.f32 %v342_v36, %v341_v37 }
 0x117   :  { %v393_v25 = vstv %s1187_s29  ;;  %v387_v26 = vstv %s1177_s24  ;;  %v397_v27 = vstv %s1193_s0  ;;  %v416_v28 = vstv %s1191_s4 }
 0x118   :  { %v326_v32 = vmul.f32 0.5, %v325_v29  ;;  %v333_v33 = vmul.f32 0.5, %v332_v30  ;;  %v344_v39 = vmul.f32 0.5, %v343_v38  ;;  %v410_v29 = vstv %s1179_s25 }
 0x119   :  { %v420_v30 = vstv %s1195_s5  ;;  %v433_v31 = vstv %s1181_s26  ;;  %v394_v34 = vmul.f32 %v393_v25, %v1034_v1  ;;  %v439_v36 = vstv %s1199_s7 }
 0x11a   :  { %880 = vtanh.f32 %v326_v32  ;;  %v456_v32 = vstv %s1183_s27  ;;  %v398_v37 = vmul.f32 %v1043_v2, %v397_v27  ;;  %v401_v38 = vstv %s1201_s8 }
 0x11b   :  { %882 = vtanh.f32 %v333_v33  ;;  %v390_v33 = vstv %s1185_s28  ;;  %v1272_v27 = vstv %s816_s20 }
 0x11c   :  { %884 = vtanh.f32 %v339_v35  ;;  %v413_v35 = vstv %s1189_s30 }
 0x11d   :  { %886 = vtanh.f32 %v344_v39  ;;  %v417_v39 = vmul.f32 %v416_v28, %v1034_v1 }
 0x124   :  { %v881_v40 = vpop.eup %880 }
 0x125   :  { %v883_v41 = vpop.eup %882  ;;  %v328_v42 = vadd.f32 1.0, %v881_v40  ;;  %v462_v40 = vstv %s1207_s11 }
 0x126   :  { %v335_v43 = vadd.f32 1.0, %v883_v41  ;;  %v885_v46 = vpop.eup %884  ;;  %v405_v41 = vstv %s1209_s12 }
 0x127   :  { %v329_v44 = vmul.f32 0.5, %v328_v42  ;;  %v887_v51 = vpop.eup %886  ;;  %v421_v42 = vmul.f32 %v1043_v2, %v420_v30  ;;  %v1276_v30 = vstv %s817_s21 }
 0x128   :  { %v336_v47 = vmul.f32 0.5, %v335_v43  ;;  %v346_v52 = vadd.f32 1.0, %v887_v51  ;;  %v424_v43 = vstv %s1203_s9  ;;  %v447_v51 = vstv %s1213_s14 }
 0x129   :  { %v349_v48 = vmul.f32 %v885_v46, %v329_v44  ;;  %v428_v44 = vstv %s1211_s13  ;;  %v436_v46 = vstv %s1197_s6 }
 0x12a   :  { %v348_v49 = vmul.f32 %v336_v47, %v319_v18  ;;  %v347_v53 = vmul.f32 0.5, %v346_v52  ;;  %v440_v47 = vmul.f32 %v439_v36, %v1034_v1  ;;  %v459_v52 = vstv %s1217_s16 }
 0x12c   :  { %v350_v50 = vadd.f32 %v349_v48, %v348_v49  ;;  %v443_v48 = vstv %s1205_s10  ;;  %v466_v49 = vstv %s1215_s15 }
 0x12e   :  { %888 = vtanh.f32 %v350_v50 }
 0x138   :  { %v889_v54 = vpop.eup %888 }
 0x139   :  { %v352_v55 = vmul.f32 %v889_v54, %v347_v53  ;;  %v463_v53 = vmul.f32 %v462_v40, %v1034_v1  ;;  %v470_v54 = vstv %s1219_s17  ;;  %v448_v1 = vmul.f32 %v1057_v7, %v447_v51 }
 0x13b   :  { %353 = vst.msk [vmem:[#allocation3 + $0x6] sm:$0x1] %vm166_vm1, %v352_v55  ;;  %v355_v56 = vmul.f32 %v352_v55, %v1113_v45  ;;  %v362_v57 = vmul.f32 %v352_v55, %v1130_v4  ;;  %v369_v60 = vmul.f32 %v352_v55, %v1135_v14  ;;  %v373_v6 = vmul.f32 %v352_v55, %v1139_v20 }
 0x13d   :  { %v356_v61 = vadd.f32 %v355_v56, %v354_v58  ;;  %v363_v62 = vadd.f32 %v362_v57, %v361_v59  ;;  %v370_v5 = vadd.f32 %v369_v60, %v368_v3  ;;  %v374_v9 = vadd.f32 %v373_v6, %v372_v8 }
 0x13e   :  { %v444_v59 = vmul.f32 %v1043_v2, %v443_v48  ;;  %v451_v60 = vstv %s1226_s1  ;;  %v402_v6 = vmul.f32 %v1057_v7, %v401_v38  ;;  %v425_v8 = vmul.f32 %v1057_v7, %v424_v43 }
 0x13f   :  { %v357_v63 = vmul.f32 0.5, %v356_v61  ;;  %v364_v0 = vmul.f32 0.5, %v363_v62  ;;  %v375_v45 = vmul.f32 0.5, %v374_v9  ;;  %v467_v61 = vmul.f32 %v1043_v2, %v466_v49 }
 0x140   :  { %v474_v62 = vstv %s1228_s18  ;;  %v471_v9 = vmul.f32 %v1057_v7, %v470_v54  ;;  %v429_v2 = vmul.f32 %v1068_v11, %v428_v44 }
 0x141   :  { %890 = vtanh.f32 %v357_v63 }
 0x142   :  { %892 = vtanh.f32 %v364_v0 }
 0x143   :  { %894 = vtanh.f32 %v370_v5 }
 0x144   :  { %896 = vtanh.f32 %v375_v45 }
 0x14b   :  { %v891_v10 = vpop.eup %890 }
 0x14c   :  { %v893_v4 = vpop.eup %892  ;;  %v359_v12 = vadd.f32 1.0, %v891_v10 }
 0x14d   :  { %v366_v13 = vadd.f32 1.0, %v893_v4  ;;  %v895_v15 = vpop.eup %894 }
 0x14e   :  { %v360_v14 = vmul.f32 0.5, %v359_v12  ;;  %v897_v21 = vpop.eup %896 }
 0x14f   :  { %v367_v16 = vmul.f32 0.5, %v366_v13  ;;  %v377_v20 = vadd.f32 1.0, %v897_v21  ;;  %v406_v13 = vmul.f32 %v1068_v11, %v405_v41 }
 0x150   :  { %v380_v17 = vmul.f32 %v895_v15, %v360_v14  ;;  %v452_v14 = vmul.f32 %v1068_v11, %v451_v60  ;;  %v475_v15 = vmul.f32 %v1068_v11, %v474_v62  ;;  %v1270_v11 = vstv %s815_s19 }
 0x151   :  { %v379_v18 = vmul.f32 %v367_v16, %v350_v50  ;;  %v378_v22 = vmul.f32 0.5, %v377_v20  ;;  %v486_v28 = vmul.f32 0.0, %v1270_v11  ;;  %v1282_v60 = vstv %s813_s22 }
 0x152   :  { %v1284_v62 = vstv %s814_s23 }
 0x153   :  { %v381_v19 = vadd.f32 %v380_v17, %v379_v18 }
 0x155   :  { %898 = vtanh.f32 %v381_v19 }
 0x15f   :  { %v899_v23 = vpop.eup %898 }
 0x160   :  { %v383_v24 = vmul.f32 %v899_v23, %v378_v22 }
 0x162   :  { %384 = vst.msk [vmem:[#allocation3 + $0x7] sm:$0x1] %vm166_vm1, %v383_v24 }
 0x169   :  { %v385_v50 = vld [vmem:[#allocation3] sm:$0xff] }
 0x16a   :  { %v388_v55 = vmul.f32 %v387_v26, %v385_v50  ;;  %v411_v56 = vmul.f32 %v410_v29, %v385_v50  ;;  %v434_v57 = vmul.f32 %v433_v31, %v385_v50  ;;  %v457_v58 = vmul.f32 %v456_v32, %v385_v50 }
 0x16b   :  { %v494_v29 = vmul.f32 0.0, %v1272_v27 }
 0x16c   :  { %v391_v63 = vadd.f32 %v390_v33, %v388_v55  ;;  %v414_v0 = vadd.f32 %v413_v35, %v411_v56  ;;  %v437_v3 = vadd.f32 %v436_v46, %v434_v57  ;;  %v460_v5 = vadd.f32 %v459_v52, %v457_v58 }
 0x16d   :  { %v502_v35 = vmul.f32 0.0, %v1276_v30 }
 0x16e   :  { %v395_v45 = vadd.f32 %v394_v34, %v391_v63  ;;  %v418_v10 = vadd.f32 %v417_v39, %v414_v0  ;;  %v441_v4 = vadd.f32 %v440_v47, %v437_v3  ;;  %v464_v12 = vadd.f32 %v463_v53, %v460_v5 }
 0x170   :  { %v399_v16 = vadd.f32 %v398_v37, %v395_v45  ;;  %v422_v17 = vadd.f32 %v421_v42, %v418_v10  ;;  %v445_v18 = vadd.f32 %v444_v59, %v441_v4  ;;  %v468_v19 = vadd.f32 %v467_v61, %v464_v12 }
 0x171   :  { %v1279_v37 = vstv %s818_s2 }
 0x172   :  { %v403_v21 = vadd.f32 %v402_v6, %v399_v16  ;;  %v426_v7 = vadd.f32 %v425_v8, %v422_v17  ;;  %v449_v20 = vadd.f32 %v448_v1, %v445_v18  ;;  %v472_v22 = vadd.f32 %v471_v9, %v468_v19 }
 0x173   :  { %v507_v41 = vmul.f32 0.0, %v1279_v37 }
 0x174   :  { %v407_v23 = vadd.f32 %v406_v13, %v403_v21  ;;  %v430_v24 = vadd.f32 %v429_v2, %v426_v7  ;;  %v453_v25 = vadd.f32 %v452_v14, %v449_v20  ;;  %v476_v26 = vadd.f32 %v475_v15, %v472_v22 }
 0x176   :  { %408 = vst.msk [vmem:[#allocation4] sm:$0xff] %vm57_vm0, %v407_v23  ;;  %431 = vst.msk [vmem:[#allocation4 + $0x8] sm:$0xff] %vm57_vm0, %v430_v24 }
 0x177   :  { %454 = vst.msk [vmem:[#allocation4 + $0x10] sm:$0xff] %vm57_vm0, %v453_v25  ;;  %477 = vst.msk [vmem:[#allocation4 + $0x18] sm:$0xff] %vm57_vm0, %v476_v26 }
 0x17d   :  { %v484_v31 = vld [vmem:[#allocation4] sm:$0x1]  ;;  %v492_v32 = vld [vmem:[#allocation4 + $0x8] sm:$0x1]  ;;  %v523_v5 = vld [vmem:[#allocation4 + $0x1] sm:$0x1] }
 0x17e   :  { %v487_v33 = vadd.f32 %v486_v28, %v484_v31  ;;  %v495_v34 = vadd.f32 %v494_v29, %v492_v32  ;;  %v500_v36 = vld [vmem:[#allocation4 + $0x10] sm:$0x1]  ;;  %v505_v42 = vld [vmem:[#allocation4 + $0x18] sm:$0x1]  ;;  %v530_v6 = vld [vmem:[#allocation4 + $0x9] sm:$0x1] }
 0x17f   :  { %v503_v40 = vadd.f32 %v502_v35, %v500_v36  ;;  %v508_v43 = vadd.f32 %v507_v41, %v505_v42  ;;  %v537_v12 = vld [vmem:[#allocation4 + $0x11] sm:$0x1]  ;;  %v541_v14 = vld [vmem:[#allocation4 + $0x19] sm:$0x1]  ;;  %v556_v36 = vld [vmem:[#allocation4 + $0x2] sm:$0x1] }
 0x180   :  { %v488_v38 = vmul.f32 0.5, %v487_v33  ;;  %v496_v39 = vmul.f32 0.5, %v495_v34 }
 0x181   :  { %v509_v44 = vmul.f32 0.5, %v508_v43 }
 0x182   :  { %900 = vtanh.f32 %v488_v38  ;;  %v563_v38 = vld [vmem:[#allocation4 + $0xa] sm:$0x1] }
 0x183   :  { %902 = vtanh.f32 %v496_v39 }
 0x184   :  { %904 = vtanh.f32 %v503_v40 }
 0x185   :  { %906 = vtanh.f32 %v509_v44 }
 0x18c   :  { %v901_v46 = vpop.eup %900 }
 0x18d   :  { %v903_v47 = vpop.eup %902  ;;  %v490_v48 = vadd.f32 1.0, %v901_v46  ;;  %v570_v46 = vld [vmem:[#allocation4 + $0x12] sm:$0x1] }
 0x18e   :  { %v498_v49 = vadd.f32 1.0, %v903_v47  ;;  %v905_v51 = vpop.eup %904 }
 0x18f   :  { %v491_v50 = vmul.f32 0.5, %v490_v48  ;;  %v907_v56 = vpop.eup %906 }
 0x190   :  { %v499_v52 = vmul.f32 0.5, %v498_v49  ;;  %v511_v57 = vadd.f32 1.0, %v907_v56  ;;  %v574_v49 = vld [vmem:[#allocation4 + $0x1a] sm:$0x1] }
 0x191   :  { %v514_v53 = vmul.f32 %v905_v51, %v491_v50 }
 0x192   :  { %v513_v54 = vmul.f32 0.0, %v499_v52  ;;  %v512_v58 = vmul.f32 0.5, %v511_v57 }
 0x194   :  { %v515_v55 = vadd.f32 %v514_v53, %v513_v54 }
 0x196   :  { %908 = vtanh.f32 %v515_v55 }
 0x1a0   :  { %v909_v59 = vpop.eup %908 }
 0x1a1   :  { %v517_v61 = vmul.f32 %v909_v59, %v512_v58 }
 0x1a3   :  { %v519_v63 = vmul.f32 %v1282_v60, %v517_v61  ;;  %v524_v0 = vmul.f32 %v517_v61, %v1270_v11  ;;  %v531_v3 = vmul.f32 %v517_v61, %v1272_v27  ;;  %v538_v45 = vmul.f32 %v517_v61, %v1276_v30 }
 0x1a4   :  { %v542_v2 = vmul.f32 %v517_v61, %v1279_v37 }
 0x1a5   :  { %v521_v8 = vadd.f32 %v1284_v62, %v519_v63  ;;  %v525_v1 = vadd.f32 %v524_v0, %v523_v5  ;;  %v532_v9 = vadd.f32 %v531_v3, %v530_v6  ;;  %v539_v13 = vadd.f32 %v538_v45, %v537_v12 }
 0x1a6   :  { %v543_v15 = vadd.f32 %v542_v2, %v541_v14 }
 0x1a7   :  { %522 = vst.msk [vmem:[%s1365_s3] sm:$0x1] %vm166_vm1, %v521_v8  ;;  %v526_v10 = vmul.f32 0.5, %v525_v1  ;;  %v533_v4 = vmul.f32 0.5, %v532_v9 }
 0x1a8   :  { %v544_v16 = vmul.f32 0.5, %v543_v15 }
 0x1a9   :  { %910 = vtanh.f32 %v526_v10  ;;  %v589_v10 = vld [vmem:[#allocation4 + $0x3] sm:$0x1] }
 0x1aa   :  { %912 = vtanh.f32 %v533_v4  ;;  %v596_v4 = vld [vmem:[#allocation4 + $0xb] sm:$0x1] }
 0x1ab   :  { %914 = vtanh.f32 %v539_v13 }
 0x1ac   :  { %916 = vtanh.f32 %v544_v16 }
 0x1b3   :  { %v911_v17 = vpop.eup %910 }
 0x1b4   :  { %v913_v18 = vpop.eup %912  ;;  %v528_v19 = vadd.f32 1.0, %v911_v17  ;;  %v603_v17 = vld [vmem:[#allocation4 + $0x13] sm:$0x1] }
 0x1b5   :  { %v535_v21 = vadd.f32 1.0, %v913_v18  ;;  %v915_v20 = vpop.eup %914 }
 0x1b6   :  { %v529_v7 = vmul.f32 0.5, %v528_v19  ;;  %v917_v26 = vpop.eup %916 }
 0x1b7   :  { %v536_v22 = vmul.f32 0.5, %v535_v21  ;;  %v546_v28 = vadd.f32 1.0, %v917_v26  ;;  %v607_v21 = vld [vmem:[#allocation4 + $0x1b] sm:$0x1] }
 0x1b8   :  { %v549_v23 = vmul.f32 %v915_v20, %v529_v7 }
 0x1b9   :  { %v548_v24 = vmul.f32 %v536_v22, %v515_v55  ;;  %v547_v29 = vmul.f32 0.5, %v546_v28 }
 0x1bb   :  { %v550_v25 = vadd.f32 %v549_v23, %v548_v24 }
 0x1bd   :  { %918 = vtanh.f32 %v550_v25 }
 0x1c7   :  { %v919_v31 = vpop.eup %918 }
 0x1c8   :  { %v552_v32 = vmul.f32 %v919_v31, %v547_v29 }
 0x1ca   :  { %v553_v33 = vmul.f32 %v552_v32, %v1282_v60  ;;  %v557_v34 = vmul.f32 %v552_v32, %v1270_v11  ;;  %v564_v35 = vmul.f32 %v552_v32, %v1272_v27  ;;  %v571_v42 = vmul.f32 %v552_v32, %v1276_v30 }
 0x1cb   :  { %v575_v48 = vmul.f32 %v552_v32, %v1279_v37 }
 0x1cc   :  { %v554_v39 = vadd.f32 %v553_v33, %v1284_v62  ;;  %v558_v40 = vadd.f32 %v557_v34, %v556_v36  ;;  %v565_v41 = vadd.f32 %v564_v35, %v563_v38  ;;  %v572_v47 = vadd.f32 %v571_v42, %v570_v46 }
 0x1cd   :  { %v576_v50 = vadd.f32 %v575_v48, %v574_v49 }
 0x1ce   :  { %555 = vst.msk [vmem:[%s1365_s3 + $0x1] sm:$0x1] %vm166_vm1, %v554_v39  ;;  %v559_v43 = vmul.f32 0.5, %v558_v40  ;;  %v566_v44 = vmul.f32 0.5, %v565_v41 }
 0x1cf   :  { %v577_v51 = vmul.f32 0.5, %v576_v50 }
 0x1d0   :  { %920 = vtanh.f32 %v559_v43  ;;  %v622_v43 = vld [vmem:[#allocation4 + $0x4] sm:$0x1] }
 0x1d1   :  { %922 = vtanh.f32 %v566_v44  ;;  %v629_v44 = vld [vmem:[#allocation4 + $0xc] sm:$0x1] }
 0x1d2   :  { %924 = vtanh.f32 %v572_v47 }
 0x1d3   :  { %926 = vtanh.f32 %v577_v51 }
 0x1da   :  { %v921_v52 = vpop.eup %920 }
 0x1db   :  { %v923_v53 = vpop.eup %922  ;;  %v561_v54 = vadd.f32 1.0, %v921_v52  ;;  %v636_v52 = vld [vmem:[#allocation4 + $0x14] sm:$0x1] }
 0x1dc   :  { %v568_v55 = vadd.f32 1.0, %v923_v53  ;;  %v925_v57 = vpop.eup %924 }
 0x1dd   :  { %v562_v56 = vmul.f32 0.5, %v561_v54  ;;  %v927_v0 = vpop.eup %926 }
 0x1de   :  { %v569_v58 = vmul.f32 0.5, %v568_v55  ;;  %v579_v3 = vadd.f32 1.0, %v927_v0  ;;  %v640_v55 = vld [vmem:[#allocation4 + $0x1c] sm:$0x1] }
 0x1df   :  { %v582_v59 = vmul.f32 %v925_v57, %v562_v56 }
 0x1e0   :  { %v581_v61 = vmul.f32 %v569_v58, %v550_v25  ;;  %v580_v5 = vmul.f32 0.5, %v579_v3 }
 0x1e2   :  { %v583_v63 = vadd.f32 %v582_v59, %v581_v61 }
 0x1e4   :  { %928 = vtanh.f32 %v583_v63 }
 0x1ee   :  { %v929_v6 = vpop.eup %928 }
 0x1ef   :  { %v585_v8 = vmul.f32 %v929_v6, %v580_v5 }
 0x1f1   :  { %v586_v1 = vmul.f32 %v585_v8, %v1282_v60  ;;  %v590_v9 = vmul.f32 %v585_v8, %v1270_v11  ;;  %v597_v45 = vmul.f32 %v585_v8, %v1272_v27  ;;  %v604_v14 = vmul.f32 %v585_v8, %v1276_v30 }
 0x1f2   :  { %v608_v19 = vmul.f32 %v585_v8, %v1279_v37 }
 0x1f3   :  { %v587_v12 = vadd.f32 %v586_v1, %v1284_v62  ;;  %v591_v13 = vadd.f32 %v590_v9, %v589_v10  ;;  %v598_v2 = vadd.f32 %v597_v45, %v596_v4  ;;  %v605_v18 = vadd.f32 %v604_v14, %v603_v17 }
 0x1f4   :  { %v609_v7 = vadd.f32 %v608_v19, %v607_v21 }
 0x1f5   :  { %588 = vst.msk [vmem:[%s1365_s3 + $0x2] sm:$0x1] %vm166_vm1, %v587_v12  ;;  %v592_v15 = vmul.f32 0.5, %v591_v13  ;;  %v599_v16 = vmul.f32 0.5, %v598_v2 }
 0x1f6   :  { %v610_v20 = vmul.f32 0.5, %v609_v7 }
 0x1f7   :  { %930 = vtanh.f32 %v592_v15  ;;  %v655_v15 = vld [vmem:[#allocation4 + $0x5] sm:$0x1] }
 0x1f8   :  { %932 = vtanh.f32 %v599_v16  ;;  %v662_v16 = vld [vmem:[#allocation4 + $0xd] sm:$0x1] }
 0x1f9   :  { %934 = vtanh.f32 %v605_v18 }
 0x1fa   :  { %936 = vtanh.f32 %v610_v20 }
 0x201   :  { %v931_v22 = vpop.eup %930 }
 0x202   :  { %v933_v23 = vpop.eup %932  ;;  %v594_v24 = vadd.f32 1.0, %v931_v22  ;;  %v669_v22 = vld [vmem:[#allocation4 + $0x15] sm:$0x1] }
 0x203   :  { %v601_v25 = vadd.f32 1.0, %v933_v23  ;;  %v935_v28 = vpop.eup %934 }
 0x204   :  { %v595_v26 = vmul.f32 0.5, %v594_v24  ;;  %v937_v34 = vpop.eup %936 }
 0x205   :  { %v602_v29 = vmul.f32 0.5, %v601_v25  ;;  %v612_v35 = vadd.f32 1.0, %v937_v34  ;;  %v673_v25 = vld [vmem:[#allocation4 + $0x1d] sm:$0x1] }
 0x206   :  { %v615_v31 = vmul.f32 %v935_v28, %v595_v26 }
 0x207   :  { %v614_v32 = vmul.f32 %v602_v29, %v583_v63  ;;  %v613_v36 = vmul.f32 0.5, %v612_v35 }
 0x209   :  { %v616_v33 = vadd.f32 %v615_v31, %v614_v32 }
 0x20b   :  { %938 = vtanh.f32 %v616_v33 }
 0x215   :  { %v939_v38 = vpop.eup %938 }
 0x216   :  { %v618_v39 = vmul.f32 %v939_v38, %v613_v36 }
 0x218   :  { %v619_v40 = vmul.f32 %v618_v39, %v1282_v60  ;;  %v623_v41 = vmul.f32 %v618_v39, %v1270_v11  ;;  %v630_v42 = vmul.f32 %v618_v39, %v1272_v27  ;;  %v637_v49 = vmul.f32 %v618_v39, %v1276_v30 }
 0x219   :  { %v641_v54 = vmul.f32 %v618_v39, %v1279_v37 }
 0x21a   :  { %v620_v46 = vadd.f32 %v619_v40, %v1284_v62  ;;  %v624_v47 = vadd.f32 %v623_v41, %v622_v43  ;;  %v631_v48 = vadd.f32 %v630_v42, %v629_v44  ;;  %v638_v53 = vadd.f32 %v637_v49, %v636_v52 }
 0x21b   :  { %v642_v56 = vadd.f32 %v641_v54, %v640_v55 }
 0x21c   :  { %621 = vst.msk [vmem:[%s1365_s3 + $0x3] sm:$0x1] %vm166_vm1, %v620_v46  ;;  %v625_v50 = vmul.f32 0.5, %v624_v47  ;;  %v632_v51 = vmul.f32 0.5, %v631_v48 }
 0x21d   :  { %v643_v57 = vmul.f32 0.5, %v642_v56 }
 0x21e   :  { %940 = vtanh.f32 %v625_v50  ;;  %v688_v50 = vld [vmem:[#allocation4 + $0x6] sm:$0x1] }
 0x21f   :  { %942 = vtanh.f32 %v632_v51  ;;  %v695_v51 = vld [vmem:[#allocation4 + $0xe] sm:$0x1] }
 0x220   :  { %944 = vtanh.f32 %v638_v53 }
 0x221   :  { %946 = vtanh.f32 %v643_v57 }
 0x228   :  { %v941_v58 = vpop.eup %940 }
 0x229   :  { %v943_v59 = vpop.eup %942  ;;  %v627_v61 = vadd.f32 1.0, %v941_v58  ;;  %v702_v58 = vld [vmem:[#allocation4 + $0x16] sm:$0x1] }
 0x22a   :  { %v634_v63 = vadd.f32 1.0, %v943_v59  ;;  %v945_v3 = vpop.eup %944 }
 0x22b   :  { %v628_v0 = vmul.f32 0.5, %v627_v61  ;;  %v947_v9 = vpop.eup %946 }
 0x22c   :  { %v635_v5 = vmul.f32 0.5, %v634_v63  ;;  %v645_v45 = vadd.f32 1.0, %v947_v9  ;;  %v706_v63 = vld [vmem:[#allocation4 + $0x1e] sm:$0x1] }
 0x22d   :  { %v648_v6 = vmul.f32 %v945_v3, %v628_v0 }
 0x22e   :  { %v647_v8 = vmul.f32 %v635_v5, %v616_v33  ;;  %v646_v10 = vmul.f32 0.5, %v645_v45 }
 0x230   :  { %v649_v1 = vadd.f32 %v648_v6, %v647_v8 }
 0x232   :  { %948 = vtanh.f32 %v649_v1 }
 0x23c   :  { %v949_v4 = vpop.eup %948 }
 0x23d   :  { %v651_v12 = vmul.f32 %v949_v4, %v646_v10 }
 0x23f   :  { %v652_v13 = vmul.f32 %v651_v12, %v1282_v60  ;;  %v656_v2 = vmul.f32 %v651_v12, %v1270_v11  ;;  %v663_v14 = vmul.f32 %v651_v12, %v1272_v27  ;;  %v670_v21 = vmul.f32 %v651_v12, %v1276_v30 }
 0x240   :  { %v674_v24 = vmul.f32 %v651_v12, %v1279_v37 }
 0x241   :  { %v653_v17 = vadd.f32 %v652_v13, %v1284_v62  ;;  %v657_v18 = vadd.f32 %v656_v2, %v655_v15  ;;  %v664_v19 = vadd.f32 %v663_v14, %v662_v16  ;;  %v671_v23 = vadd.f32 %v670_v21, %v669_v22 }
 0x242   :  { %v675_v26 = vadd.f32 %v674_v24, %v673_v25 }
 0x243   :  { %654 = vst.msk [vmem:[%s1365_s3 + $0x4] sm:$0x1] %vm166_vm1, %v653_v17  ;;  %v658_v7 = vmul.f32 0.5, %v657_v18  ;;  %v665_v20 = vmul.f32 0.5, %v664_v19 }
 0x244   :  { %v676_v28 = vmul.f32 0.5, %v675_v26 }
 0x245   :  { %950 = vtanh.f32 %v658_v7  ;;  %v721_v7 = vld [vmem:[#allocation4 + $0x7] sm:$0x1] }
 0x246   :  { %952 = vtanh.f32 %v665_v20  ;;  %v728_v20 = vld [vmem:[#allocation4 + $0xf] sm:$0x1] }
 0x247   :  { %954 = vtanh.f32 %v671_v23 }
 0x248   :  { %956 = vtanh.f32 %v676_v28 }
 0x24f   :  { %v951_v29 = vpop.eup %950 }
 0x250   :  { %v953_v31 = vpop.eup %952  ;;  %v660_v32 = vadd.f32 1.0, %v951_v29  ;;  %v735_v29 = vld [vmem:[#allocation4 + $0x17] sm:$0x1] }
 0x251   :  { %v667_v33 = vadd.f32 1.0, %v953_v31  ;;  %v955_v35 = vpop.eup %954  ;;  %v739_v31 = vld [vmem:[#allocation4 + $0x1f] sm:$0x1] }
 0x252   :  { %v661_v34 = vmul.f32 0.5, %v660_v32  ;;  %v957_v41 = vpop.eup %956 }
 0x253   :  { %v668_v36 = vmul.f32 0.5, %v667_v33  ;;  %v678_v42 = vadd.f32 1.0, %v957_v41 }
 0x254   :  { %v681_v38 = vmul.f32 %v955_v35, %v661_v34 }
 0x255   :  { %v680_v39 = vmul.f32 %v668_v36, %v649_v1  ;;  %v679_v43 = vmul.f32 0.5, %v678_v42 }
 0x257   :  { %v682_v40 = vadd.f32 %v681_v38, %v680_v39 }
 0x259   :  { %958 = vtanh.f32 %v682_v40 }
 0x263   :  { %v959_v44 = vpop.eup %958 }
 0x264   :  { %v684_v46 = vmul.f32 %v959_v44, %v679_v43 }
 0x266   :  { %v685_v47 = vmul.f32 %v684_v46, %v1282_v60  ;;  %v689_v48 = vmul.f32 %v684_v46, %v1270_v11  ;;  %v696_v49 = vmul.f32 %v684_v46, %v1272_v27  ;;  %v703_v55 = vmul.f32 %v684_v46, %v1276_v30 }
 0x267   :  { %v707_v61 = vmul.f32 %v684_v46, %v1279_v37 }
 0x268   :  { %v686_v52 = vadd.f32 %v685_v47, %v1284_v62  ;;  %v690_v53 = vadd.f32 %v689_v48, %v688_v50  ;;  %v697_v54 = vadd.f32 %v696_v49, %v695_v51  ;;  %v704_v59 = vadd.f32 %v703_v55, %v702_v58 }
 0x269   :  { %v708_v0 = vadd.f32 %v707_v61, %v706_v63 }
 0x26a   :  { %687 = vst.msk [vmem:[%s1365_s3 + $0x5] sm:$0x1] %vm166_vm1, %v686_v52  ;;  %v691_v56 = vmul.f32 0.5, %v690_v53  ;;  %v698_v57 = vmul.f32 0.5, %v697_v54 }
 0x26b   :  { %v709_v3 = vmul.f32 0.5, %v708_v0 }
 0x26c   :  { %960 = vtanh.f32 %v691_v56 }
 0x26d   :  { %962 = vtanh.f32 %v698_v57 }
 0x26e   :  { %964 = vtanh.f32 %v704_v59 }
 0x26f   :  { %966 = vtanh.f32 %v709_v3 }
 0x276   :  { %v961_v5 = vpop.eup %960 }
 0x277   :  { %v963_v6 = vpop.eup %962  ;;  %v693_v8 = vadd.f32 1.0, %v961_v5 }
 0x278   :  { %v700_v1 = vadd.f32 1.0, %v963_v6  ;;  %v965_v45 = vpop.eup %964 }
 0x279   :  { %v694_v9 = vmul.f32 0.5, %v693_v8  ;;  %v967_v2 = vpop.eup %966 }
 0x27a   :  { %v701_v10 = vmul.f32 0.5, %v700_v1  ;;  %v711_v14 = vadd.f32 1.0, %v967_v2 }
 0x27b   :  { %v714_v4 = vmul.f32 %v965_v45, %v694_v9 }
 0x27c   :  { %v713_v12 = vmul.f32 %v701_v10, %v682_v40  ;;  %v712_v15 = vmul.f32 0.5, %v711_v14 }
 0x27e   :  { %v715_v13 = vadd.f32 %v714_v4, %v713_v12 }
 0x280   :  { %968 = vtanh.f32 %v715_v13 }
 0x28a   :  { %v969_v16 = vpop.eup %968 }
 0x28b   :  { %v717_v17 = vmul.f32 %v969_v16, %v712_v15 }
 0x28d   :  { %v718_v18 = vmul.f32 %v717_v17, %v1282_v60  ;;  %v722_v19 = vmul.f32 %v717_v17, %v1270_v11  ;;  %v729_v21 = vmul.f32 %v717_v17, %v1272_v27  ;;  %v736_v23 = vmul.f32 %v717_v17, %v1276_v30 }
 0x28e   :  { %v740_v27 = vmul.f32 %v717_v17, %v1279_v37 }
 0x28f   :  { %v719_v22 = vadd.f32 %v718_v18, %v1284_v62  ;;  %v723_v24 = vadd.f32 %v722_v19, %v721_v7  ;;  %v730_v25 = vadd.f32 %v729_v21, %v728_v20  ;;  %v737_v11 = vadd.f32 %v736_v23, %v735_v29 }
 0x290   :  { %v741_v32 = vadd.f32 %v740_v27, %v739_v31 }
 0x291   :  { %720 = vst.msk [vmem:[%s1365_s3 + $0x6] sm:$0x1] %vm166_vm1, %v719_v22  ;;  %v724_v26 = vmul.f32 0.5, %v723_v24  ;;  %v731_v28 = vmul.f32 0.5, %v730_v25 }
 0x292   :  { %v742_v33 = vmul.f32 0.5, %v741_v32 }
 0x293   :  { %970 = vtanh.f32 %v724_v26 }
 0x294   :  { %972 = vtanh.f32 %v731_v28 }
 0x295   :  { %974 = vtanh.f32 %v737_v11 }
 0x296   :  { %976 = vtanh.f32 %v742_v33 }
 0x29d   :  { %v971_v30 = vpop.eup %970 }
 0x29e   :  { %v973_v34 = vpop.eup %972  ;;  %v726_v35 = vadd.f32 1.0, %v971_v30 }
 0x29f   :  { %v733_v36 = vadd.f32 1.0, %v973_v34  ;;  %v975_v39 = vpop.eup %974 }
 0x2a0   :  { %v727_v38 = vmul.f32 0.5, %v726_v35  ;;  %v977_v44 = vpop.eup %976 }
 0x2a1   :  { %v734_v40 = vmul.f32 0.5, %v733_v36  ;;  %v744_v46 = vadd.f32 1.0, %v977_v44 }
 0x2a2   :  { %v747_v41 = vmul.f32 %v975_v39, %v727_v38 }
 0x2a3   :  { %v746_v42 = vmul.f32 %v734_v40, %v715_v13  ;;  %v745_v37 = vmul.f32 0.5, %v744_v46 }
 0x2a5   :  { %v748_v43 = vadd.f32 %v747_v41, %v746_v42 }
 0x2a7   :  { %978 = vtanh.f32 %v748_v43 }
 0x2b1   :  { %v979_v47 = vpop.eup %978 }
 0x2b2   :  { %v750_v48 = vmul.f32 %v979_v47, %v745_v37 }
 0x2b4   :  { %v751_v49 = vmul.f32 %v750_v48, %v1282_v60 }
 0x2b6   :  { %v752_v50 = vadd.f32 %v751_v49, %v1284_v62 }
 0x2b8   :  { %753 = vst.msk [vmem:[%s1365_s3 + $0x7] sm:$0x1] %vm166_vm1, %v752_v50 }
 0x2b9   :  { %758 = vsyncpa [#allocation6], 1 }

</bundles_post_ra>
